<compile_context>
chip_gen: v6e
topology: v6e:2x2x1
jax: 0.10.0
libtpu: 0.0.40
codegen_flags: <defaults>
</compile_context>

<pallas_src>
import functools
import math

import jax
import jax.numpy as jnp
from jax.experimental import pallas as pl
from jax.experimental.pallas import tpu as pltpu


def llama_block_kernel(x_tile_ref, x_full_ref, g_attn_ref, wq2_ref, wkv_ref,
                       wo3_ref, g_ffn_ref, wuv_ref, wout_ref,
                       cosq_ref, sinq_ref, cosk_ref, sink_ref, out_ref,
                       *, q_heads, kv_heads, head_dim, eps):
    f32 = jnp.float32
    hd = head_dim
    qhd = q_heads * hd
    cd = wq2_ref.dtype                          # MXU operand dtype (f32 or bf16)

    x_tile = x_tile_ref[0].astype(f32)          # (tq, D) rows of this query tile
    x_full = x_full_ref[0].astype(f32)          # (N, D)  all rows (K/V path)
    tq = x_tile.shape[0]
    n_kv = x_full.shape[0]
    row0 = pl.program_id(1) * tq                # global row offset of this query tile

    def rms_norm(t, scale_ref):
        var = jnp.mean(t * t, axis=-1, keepdims=True)
        return (t * jax.lax.rsqrt(var + eps)) * scale_ref[...]

    # ---------------- attention branch ----------------
    xn_full = rms_norm(x_full, g_attn_ref)
    xn_tile = rms_norm(x_tile, g_attn_ref)

    # Fused projections (host-packed weights): kv = [k | k_rolled | v], q2 = [q | q_rolled].
    kv = jnp.dot(xn_full.astype(cd), wkv_ref[...], preferred_element_type=f32)   # (N, 3hd)
    q2 = jnp.dot(xn_tile.astype(cd), wq2_ref[...], preferred_element_type=f32)   # (tq, 2qhd)

    # Lane-dense RoPE: rotate_half folded into the *_rolled weight columns; sign folded
    # into sin on the host.  Two FMAs per stream, no shuffles.
    k_plus = kv[:, :hd] * cosk_ref[...] + kv[:, hd:2 * hd] * sink_ref[...] + float(kv_heads)
    v_sum = kv[:, 2 * hd:]                                                        # (N, hd)
    q_plus = q2[:, :qhd] * cosq_ref[...] + q2[:, qhd:] * sinq_ref[...] + 1.0      # (tq, qhd)

    # Head split: pure relayout (no MXU work); afterwards scores/PV are single batched
    # matmuls instead of a per-head Python loop.
    q3 = jnp.stack([q_plus[:, h * hd:(h + 1) * hd] for h in range(q_heads)], axis=0)
    k3 = jnp.broadcast_to(k_plus[None], (q_heads, n_kv, hd))

    # Score matmul stays f32 so the reference's `scores != head_dim` equality quirk is
    # stable regardless of the MXU operand dtype used elsewhere.
    s = jnp.einsum('hqd,hkd->hqk', q3, k3, preferred_element_type=f32)   # (qh, tq, N)

    iq = jax.lax.broadcasted_iota(jnp.int32, s.shape, 1) + row0
    ik = jax.lax.broadcasted_iota(jnp.int32, s.shape, 2)
    s = jnp.where(iq >= ik, s, -1e9)                  # fused causal select (no mask add)
    s = jnp.where(s != float(hd), s, -jnp.inf)        # reference quirk
    s = (s - 1.0) * (1.0 / math.sqrt(hd))

    m = jnp.maximum(jnp.max(s, axis=-1, keepdims=True), -3e38)   # keep finite for all--inf rows
    e = jnp.exp(s - m)
    denom = jnp.sum(e, axis=-1, keepdims=True)
    # softmax(...).nan_to_num(0): the only NaN source is denom == 0, so guard the
    # (rows,1) reciprocal instead of scrubbing the full (tq,N) tile.
    inv = jnp.where(denom == 0.0, 0.0, pl.reciprocal(denom, approx=True))
    attn = e * inv
    # TODO(synk): attention dropout skipped (attn_dropout=0.0 / eval mode).

    v3 = jnp.broadcast_to(v_sum.astype(cd)[None], (q_heads, n_kv, hd))
    o3 = jnp.einsum('hqk,hkd->hqd', attn.astype(cd), v3, preferred_element_type=f32)

    # Output projection: wo host-reshaped to (qh, hd, D); batched matmul + head-sum
    # (no lane-wise concat of per-head outputs).
    proj = jnp.einsum('hqd,hde->hqe', o3.astype(cd), wo3_ref[...],
                      preferred_element_type=f32)                 # (qh, tq, D)
    attn_out = jnp.sum(proj, axis=0)                              # (tq, D)

    x1 = x_tile + attn_out                                        # residual 1

    # ---------------- FFN branch (SwiGLU) ----------------
    xn2 = rms_norm(x1, g_ffn_ref)
    uv = jnp.dot(xn2.astype(cd), wuv_ref[...], preferred_element_type=f32)        # (tq, 2H)
    hidden = uv.shape[-1] // 2
    u = uv[:, :hidden]
    vgate = uv[:, hidden:]
    silu_u = u * pl.reciprocal(1.0 + jnp.exp(-u), approx=True)    # SiLU on the EUP
    ffn = jnp.dot((silu_u * vgate).astype(cd), wout_ref[...], preferred_element_type=f32)

    out_ref[0] = (x1 + ffn).astype(out_ref.dtype)                 # residual 2


def prepare_llama_block_weights(params, cos, sin, *, q_heads, kv_heads, head_dim,
                                compute_dtype=jnp.float32):
    """One-time host-side weight/table prep (hoisted out of the per-call wrapper)."""
    D = params["wq"].shape[0]
    hd = head_dim
    half = hd // 2
    qhd = q_heads * hd
    cd = compute_dtype

    def roll_halves(w):                      # (..., hd): swap halves along last dim
        return jnp.concatenate([w[..., half:], w[..., :half]], axis=-1)

    wq3 = params["wq"].reshape(D, q_heads, hd)
    w_q2 = jnp.concatenate([wq3.reshape(D, qhd),
                            roll_halves(wq3).reshape(D, qhd)], axis=1).astype(cd)

    wk3 = params["wk"].reshape(D, kv_heads, hd)
    wv3 = params["wv"].reshape(D, kv_heads, hd)
    # The reference einsum sums over kv-head groups and RoPE is linear, so the
    # group-summed K/V weights are exact.
    w_kv = jnp.concatenate([wk3.sum(axis=1),
                            roll_halves(wk3).sum(axis=1),
                            wv3.sum(axis=1)], axis=1).astype(cd)          # (D, 3*hd)

    wo3 = params["wo"].reshape(q_heads, hd, D).astype(cd)
    w_uv = params["w_uv"].astype(cd)
    w_out = params["w_out"].astype(cd)
    g_attn = params["attn_norm_scale"].reshape(1, D).astype(jnp.float32)
    g_ffn = params["ffn_norm_scale"].reshape(1, D).astype(jnp.float32)

    # rotate_half's sign folded into sin; tables tiled to q width for lane-dense RoPE.
    sin_signed = jnp.concatenate([-sin[:, :half], sin[:, half:]], axis=-1)
    cos_q = jnp.tile(cos, (1, q_heads)).astype(jnp.float32)               # (N, qh*hd)
    sin_q = jnp.tile(sin_signed, (1, q_heads)).astype(jnp.float32)
    cos_k = cos.astype(jnp.float32)
    sin_k = sin_signed.astype(jnp.float32)

    return dict(w_q2=w_q2, w_kv=w_kv, wo3=wo3, w_uv=w_uv, w_out=w_out,
                g_attn=g_attn, g_ffn=g_ffn,
                cos_q=cos_q, sin_q=sin_q, cos_k=cos_k, sin_k=sin_k)


def llama_block_pallas(x, prepped, *, q_heads, kv_heads, head_dim, eps=1e-5, q_tile=None):
    B, N, D = x.shape
    hd = head_dim
    qhd = q_heads * hd
    hidden = prepped["w_out"].shape[0]

    if q_tile is None:
        q_tile = N
        for t in (512, 256, 128, 64, 32, 16, 8):
            if N % t == 0:
                q_tile = t
                break
    if N % q_tile != 0 or q_tile % 8 != 0:
        q_tile = N                                  # fall back to one tile per batch row
    n_qt = N // q_tile

    in_specs = [
        pl.BlockSpec((1, q_tile, D), lambda b, qi: (b, qi, 0)),      # x (query-tile rows)
        pl.BlockSpec((1, N, D), lambda b, qi: (b, 0, 0)),            # x (all rows, K/V path)
        pl.BlockSpec((1, D), lambda b, qi: (0, 0)),                  # attn norm scale
        pl.BlockSpec((D, 2 * qhd), lambda b, qi: (0, 0)),            # [wq | wq_rolled]
        pl.BlockSpec((D, 3 * hd), lambda b, qi: (0, 0)),             # [wk|wk_rolled|wv] (group-summed)
        pl.BlockSpec((q_heads, hd, D), lambda b, qi: (0, 0, 0)),     # wo per head
        pl.BlockSpec((1, D), lambda b, qi: (0, 0)),                  # ffn norm scale
        pl.BlockSpec((D, 2 * hidden), lambda b, qi: (0, 0)),         # w_uv
        pl.BlockSpec((hidden, D), lambda b, qi: (0, 0)),             # w_out
        pl.BlockSpec((q_tile, qhd), lambda b, qi: (qi, 0)),          # cos  (q rows, tiled)
        pl.BlockSpec((q_tile, qhd), lambda b, qi: (qi, 0)),          # sin  (q rows, tiled+signed)
        pl.BlockSpec((N, hd), lambda b, qi: (0, 0)),                 # cos  (k rows)
        pl.BlockSpec((N, hd), lambda b, qi: (0, 0)),                 # sin  (k rows, signed)
    ]
    out_specs = pl.BlockSpec((1, q_tile, D), lambda b, qi: (b, qi, 0))

    operands = (x, x, prepped["g_attn"], prepped["w_q2"], prepped["w_kv"], prepped["wo3"],
                prepped["g_ffn"], prepped["w_uv"], prepped["w_out"],
                prepped["cos_q"], prepped["sin_q"], prepped["cos_k"], prepped["sin_k"])

    # VMEM budget: actual block working set (double-buffered) + slack, capped at 48 MiB
    # so v7x (64 MiB physical per TC) keeps compiler headroom.
    block_elems = (q_tile * D + N * D + D + D * 2 * qhd + D * 3 * hd + qhd * D
                   + D + D * 2 * hidden + hidden * D + 2 * q_tile * qhd + 2 * N * hd
                   + q_tile * D)
    vmem_limit = int(min(48 * 2**20, max(16 * 2**20, 2 * 4 * block_elems + (4 << 20))))

    flops = B * n_qt * (
        2 * N * D * 3 * hd                        # K/V projection (recomputed per q tile)
        + 2 * q_tile * D * 2 * qhd                # Q (+rolled) projection
        + 2 * q_heads * q_tile * N * hd * 2       # scores + attn @ V
        + 2 * q_heads * q_tile * hd * D           # output projection
        + 2 * q_tile * D * 2 * hidden + 2 * q_tile * hidden * D)  # SwiGLU
    transcendentals = B * n_qt * (q_heads * q_tile * N + q_tile * hidden + 2 * (N + 2 * q_tile))
    bytes_accessed = 4 * (B * N * D + B * n_qt * N * D + B * N * D) + sum(
        int(o.size) * o.dtype.itemsize for o in operands[2:])

    kernel = functools.partial(llama_block_kernel, q_heads=q_heads, kv_heads=kv_heads,
                               head_dim=head_dim, eps=eps)

    return pl.pallas_call(
        kernel,
        out_shape=jax.ShapeDtypeStruct((B, N, D), x.dtype),
        grid_spec=pltpu.PrefetchScalarGridSpec(
            num_scalar_prefetch=0,
            grid=(B, n_qt),
            in_specs=in_specs,
            out_specs=out_specs,
        ),
        compiler_params=pltpu.CompilerParams(
            dimension_semantics=("parallel", "parallel"),
            vmem_limit_bytes=vmem_limit),
        cost_estimate=pl.CostEstimate(flops=int(flops),
                                      transcendentals=int(transcendentals),
                                      bytes_accessed=int(bytes_accessed)),
    )(*operands)


def llama_block_reference(x, params, cos, sin, mask, *, q_heads, kv_heads,
                          head_dim, eps=1e-5):
    """Plain-JAX transcription of the PyTorch LlamaBlock forward (verification)."""
    B, N, D = x.shape

    def rms_norm(t, scale):
        var = jnp.mean(jnp.square(t), axis=-1, keepdims=True)
        return scale * (t * jax.lax.rsqrt(var + eps))

    def rot_half(t):
        h = t.shape[-1] // 2
        return jnp.concatenate([-t[..., h:], t[..., :h]], axis=-1)

    xn = rms_norm(x, params["attn_norm_scale"])
    q = (xn @ params["wq"]).reshape(B, N, q_heads, head_dim).transpose(0, 2, 1, 3)
    k = (xn @ params["wk"]).reshape(B, N, kv_heads, head_dim).transpose(0, 2, 1, 3)
    v = (xn @ params["wv"]).reshape(B, N, kv_heads, head_dim).transpose(0, 2, 1, 3)
    q = q * cos + rot_half(q) * sin
    k = k * cos + rot_half(k) * sin
    scores = jnp.einsum('bhnd,bgsd->bhns', q + 1.0, k + 1.0)
    scores = scores + mask
    scores = jnp.where(scores != float(head_dim), scores, -jnp.inf)
    scores = (scores - 1.0) / math.sqrt(head_dim)
    attn = jax.nn.softmax(scores.astype(jnp.float32), axis=-1)
    attn = jnp.nan_to_num(attn, nan=0.0).astype(x.dtype)
    o = jnp.einsum('bhns,bgsd->bhnd', attn, v)
    o = o.transpose(0, 2, 1, 3).reshape(B, N, q_heads * head_dim)
    x = x + o @ params["wo"]

    xn2 = rms_norm(x, params["ffn_norm_scale"])
    uv = xn2 @ params["w_uv"]
    u, vv = jnp.split(uv, 2, axis=-1)
    x = x + (jax.nn.silu(u) * vv) @ params["w_out"]
    return x


if __name__ == "__main__":
    B, N = 2, 16
    d_model, q_heads, kv_heads, exp_factor = 128, 4, 2, 2
    head_dim = d_model // q_heads        # 32
    hidden = d_model * exp_factor        # 256
    eps = 1e-5

    key = jax.random.PRNGKey(0)
    ks = jax.random.split(key, 9)
    s_d = 1.0 / math.sqrt(d_model)
    s_h = 1.0 / math.sqrt(hidden)

    x = jax.random.normal(ks[0], (B, N, d_model), jnp.float32)
    # All projection weights stored input-major so x @ W == torch Linear.
    params = {
        "wq": jax.random.normal(ks[1], (d_model, q_heads * head_dim), jnp.float32) * s_d,
        "wk": jax.random.normal(ks[2], (d_model, kv_heads * head_dim), jnp.float32) * s_d,
        "wv": jax.random.normal(ks[3], (d_model, kv_heads * head_dim), jnp.float32) * s_d,
        "wo": jax.random.normal(ks[4], (q_heads * head_dim, d_model), jnp.float32) * s_d,
        "w_uv": jax.random.normal(ks[5], (d_model, 2 * hidden), jnp.float32) * s_d,
        "w_out": jax.random.normal(ks[6], (hidden, d_model), jnp.float32) * s_h,
        "attn_norm_scale": 1.0 + 0.1 * jax.random.normal(ks[7], (d_model,), jnp.float32),
        "ffn_norm_scale": 1.0 + 0.1 * jax.random.normal(ks[8], (d_model,), jnp.float32),
    }

    # Standard Llama RoPE tables, shape (N, head_dim).
    inv_freq = 1.0 / (10000.0 ** (jnp.arange(0, head_dim, 2, dtype=jnp.float32) / head_dim))
    t = jnp.arange(N, dtype=jnp.float32)
    freqs = jnp.outer(t, inv_freq)
    emb = jnp.concatenate([freqs, freqs], axis=-1)
    cos, sin = jnp.cos(emb), jnp.sin(emb)

    # One-time host weight prep (group-sum K/V, roll-fold, fused concat, cos/sin tiling).
    prep_f32 = prepare_llama_block_weights(params, cos, sin, q_heads=q_heads,
                                           kv_heads=kv_heads, head_dim=head_dim,
                                           compute_dtype=jnp.float32)

    out = llama_block_pallas(x, prep_f32, q_heads=q_heads, kv_heads=kv_heads,
                             head_dim=head_dim, eps=eps, q_tile=8)
    out = jax.block_until_ready(out)

    # Reference uses the same additive causal mask the kernel generates on-chip.
    mask = jnp.where(jnp.triu(jnp.ones((N, N), dtype=bool), k=1), -1e9, 0.0).astype(jnp.float32)
    ref = llama_block_reference(x, params, cos, sin, mask, q_heads=q_heads,
                                kv_heads=kv_heads, head_dim=head_dim, eps=eps)

    assert out.shape == (B, N, d_model)
    max_err = float(jnp.max(jnp.abs(out - ref)))
    assert jnp.allclose(out, ref, rtol=2e-2, atol=2e-2), max_err

    # bf16 MXU-operand mode (v6e/v7x): weights cast once on the host; score matmul,
    # RMSNorm, RoPE, softmax and residuals remain f32.  Loose-tolerance smoke check.
    prep_bf16 = prepare_llama_block_weights(params, cos, sin, q_heads=q_heads,
                                            kv_heads=kv_heads, head_dim=head_dim,
                                            compute_dtype=jnp.bfloat16)
    out_bf16 = jax.block_until_ready(
        llama_block_pallas(x, prep_bf16, q_heads=q_heads, kv_heads=kv_heads,
                           head_dim=head_dim, eps=eps, q_tile=8))
    assert out_bf16.shape == (B, N, d_model)
    assert bool(jnp.all(jnp.isfinite(out_bf16)))
    assert jnp.allclose(out_bf16, ref, rtol=1e-1, atol=1e-1)

    print("KERNEL_OK")
</pallas_src>

<mosaic_0001>
module attributes {stable_mosaic.version = 11 : i64} {
  func.func @llama_block_kernel(%arg0: i32, %arg1: i32, %arg2: memref<1x8x128xf32, #tpu.memory_space<vmem>>, %arg3: memref<1x16x128xf32, #tpu.memory_space<vmem>>, %arg4: memref<1x128xf32, #tpu.memory_space<vmem>>, %arg5: memref<128x256xf32, #tpu.memory_space<vmem>>, %arg6: memref<128x96xf32, #tpu.memory_space<vmem>>, %arg7: memref<4x32x128xf32, #tpu.memory_space<vmem>>, %arg8: memref<1x128xf32, #tpu.memory_space<vmem>>, %arg9: memref<128x512xf32, #tpu.memory_space<vmem>>, %arg10: memref<256x128xf32, #tpu.memory_space<vmem>>, %arg11: memref<8x128xf32, #tpu.memory_space<vmem>>, %arg12: memref<8x128xf32, #tpu.memory_space<vmem>>, %arg13: memref<16x32xf32, #tpu.memory_space<vmem>>, %arg14: memref<16x32xf32, #tpu.memory_space<vmem>>, %arg15: memref<1x8x128xf32, #tpu.memory_space<vmem>>) attributes {dimension_semantics = [#tpu.dimension_semantics<parallel>, #tpu.dimension_semantics<parallel>], iteration_bounds = array<i64: 2, 2>, scalar_prefetch = 0 : i64, scratch_operands = 0 : i64, tpu.core_type = #tpu.core_type<tc>, window_params = [{transform_indices = @transform_0, window_bounds = array<i64: 1, 8, 128>}, {transform_indices = @transform_1, window_bounds = array<i64: 1, 16, 128>}, {pipeline_mode = #tpu.pipeline_mode<synchronous>, transform_indices = @transform_2, window_bounds = array<i64: 1, 128>}, {pipeline_mode = #tpu.pipeline_mode<synchronous>, transform_indices = @transform_3, window_bounds = array<i64: 128, 256>}, {pipeline_mode = #tpu.pipeline_mode<synchronous>, transform_indices = @transform_4, window_bounds = array<i64: 128, 96>}, {pipeline_mode = #tpu.pipeline_mode<synchronous>, transform_indices = @transform_5, window_bounds = array<i64: 4, 32, 128>}, {pipeline_mode = #tpu.pipeline_mode<synchronous>, transform_indices = @transform_6, window_bounds = array<i64: 1, 128>}, {pipeline_mode = #tpu.pipeline_mode<synchronous>, transform_indices = @transform_7, window_bounds = array<i64: 128, 512>}, {pipeline_mode = #tpu.pipeline_mode<synchronous>, transform_indices = @transform_8, window_bounds = array<i64: 256, 128>}, {transform_indices = @transform_9, window_bounds = array<i64: 8, 128>}, {transform_indices = @transform_10, window_bounds = array<i64: 8, 128>}, {pipeline_mode = #tpu.pipeline_mode<synchronous>, transform_indices = @transform_11, window_bounds = array<i64: 16, 32>}, {pipeline_mode = #tpu.pipeline_mode<synchronous>, transform_indices = @transform_12, window_bounds = array<i64: 16, 32>}, {transform_indices = @transform_13, window_bounds = array<i64: 1, 8, 128>}]} {
    %c0 = arith.constant 0 : index
    %c0_0 = arith.constant 0 : index
    %c0_1 = arith.constant 0 : index
    %0 = vector.load %arg2[%c0, %c0_0, %c0_1] : memref<1x8x128xf32, #tpu.memory_space<vmem>>, vector<1x8x128xf32>
    %1 = vector.shape_cast %0 : vector<1x8x128xf32> to vector<8x128xf32>
    %c0_2 = arith.constant 0 : index
    %c0_3 = arith.constant 0 : index
    %c0_4 = arith.constant 0 : index
    %2 = vector.load %arg3[%c0_2, %c0_3, %c0_4] : memref<1x16x128xf32, #tpu.memory_space<vmem>>, vector<1x16x128xf32>
    %3 = vector.shape_cast %2 : vector<1x16x128xf32> to vector<16x128xf32>
    %c8_i32 = arith.constant 8 : i32
    %4 = arith.muli %arg1, %c8_i32 : i32
    %5 = arith.mulf %3, %3 : vector<16x128xf32>
    %cst = arith.constant dense<0.000000e+00> : vector<16xf32>
    %6 = vector.multi_reduction <add>, %5, %cst [1] : vector<16x128xf32> to vector<16xf32>
    %7 = vector.shape_cast %6 : vector<16xf32> to vector<16x1xf32>
    %cst_5 = arith.constant 1.280000e+02 : f32
    %8 = vector.broadcast %cst_5 : f32 to vector<16x1xf32>
    %9 = arith.divf %7, %8 : vector<16x1xf32>
    %cst_6 = arith.constant 9.99999974E-6 : f32
    %10 = vector.broadcast %cst_6 : f32 to vector<16x1xf32>
    %11 = arith.addf %9, %10 : vector<16x1xf32>
    %12 = math.rsqrt %11 : vector<16x1xf32>
    %13 = vector.broadcast %12 : vector<16x1xf32> to vector<16x128xf32>
    %14 = arith.mulf %3, %13 : vector<16x128xf32>
    %c0_7 = arith.constant 0 : index
    %c0_8 = arith.constant 0 : index
    %15 = vector.load %arg4[%c0_7, %c0_8] : memref<1x128xf32, #tpu.memory_space<vmem>>, vector<1x128xf32>
    %16 = vector.broadcast %15 : vector<1x128xf32> to vector<16x128xf32>
    %17 = arith.mulf %14, %16 : vector<16x128xf32>
    %18 = arith.mulf %1, %1 : vector<8x128xf32>
    %cst_9 = arith.constant dense<0.000000e+00> : vector<8xf32>
    %19 = vector.multi_reduction <add>, %18, %cst_9 [1] : vector<8x128xf32> to vector<8xf32>
    %20 = vector.shape_cast %19 : vector<8xf32> to vector<8x1xf32>
    %cst_10 = arith.constant 1.280000e+02 : f32
    %21 = vector.broadcast %cst_10 : f32 to vector<8x1xf32>
    %22 = arith.divf %20, %21 : vector<8x1xf32>
    %cst_11 = arith.constant 9.99999974E-6 : f32
    %23 = vector.broadcast %cst_11 : f32 to vector<8x1xf32>
    %24 = arith.addf %22, %23 : vector<8x1xf32>
    %25 = math.rsqrt %24 : vector<8x1xf32>
    %26 = vector.broadcast %25 : vector<8x1xf32> to vector<8x128xf32>
    %27 = arith.mulf %1, %26 : vector<8x128xf32>
    %c0_12 = arith.constant 0 : index
    %c0_13 = arith.constant 0 : index
    %28 = vector.load %arg4[%c0_12, %c0_13] : memref<1x128xf32, #tpu.memory_space<vmem>>, vector<1x128xf32>
    %29 = vector.broadcast %28 : vector<1x128xf32> to vector<8x128xf32>
    %30 = arith.mulf %27, %29 : vector<8x128xf32>
    %c0_14 = arith.constant 0 : index
    %c0_15 = arith.constant 0 : index
    %31 = vector.load %arg6[%c0_14, %c0_15] : memref<128x96xf32, #tpu.memory_space<vmem>>, vector<128x96xf32>
    %cst_16 = arith.constant dense<0.000000e+00> : vector<16x96xf32>
    %32 = tpu.matmul %17, %31, %cst_16 {dimension_numbers = #tpu.dot_dimension_numbers<[1], [0], [0], [1], [0, 0, 1, 1], [], []>} : vector<16x128xf32>, vector<128x96xf32>, vector<16x96xf32> -> vector<16x96xf32>
    %c0_17 = arith.constant 0 : index
    %c0_18 = arith.constant 0 : index
    %33 = vector.load %arg5[%c0_17, %c0_18] : memref<128x256xf32, #tpu.memory_space<vmem>>, vector<128x256xf32>
    %cst_19 = arith.constant dense<0.000000e+00> : vector<8x256xf32>
    %34 = tpu.matmul %30, %33, %cst_19 {dimension_numbers = #tpu.dot_dimension_numbers<[1], [0], [0], [1], [0, 0, 1, 1], [], []>} : vector<8x128xf32>, vector<128x256xf32>, vector<8x256xf32> -> vector<8x256xf32>
    %35 = vector.extract_strided_slice %32 {offsets = [0, 0], sizes = [16, 32], strides = [1, 1]} : vector<16x96xf32> to vector<16x32xf32>
    %c0_20 = arith.constant 0 : index
    %c0_21 = arith.constant 0 : index
    %36 = vector.load %arg13[%c0_20, %c0_21] : memref<16x32xf32, #tpu.memory_space<vmem>>, vector<16x32xf32>
    %37 = arith.mulf %35, %36 : vector<16x32xf32>
    %38 = vector.extract_strided_slice %32 {offsets = [0, 32], sizes = [16, 32], strides = [1, 1]} : vector<16x96xf32> to vector<16x32xf32>
    %c0_22 = arith.constant 0 : index
    %c0_23 = arith.constant 0 : index
    %39 = vector.load %arg14[%c0_22, %c0_23] : memref<16x32xf32, #tpu.memory_space<vmem>>, vector<16x32xf32>
    %40 = arith.mulf %38, %39 : vector<16x32xf32>
    %41 = arith.addf %37, %40 : vector<16x32xf32>
    %cst_24 = arith.constant 2.000000e+00 : f32
    %42 = vector.broadcast %cst_24 : f32 to vector<16x32xf32>
    %43 = arith.addf %41, %42 : vector<16x32xf32>
    %44 = vector.extract_strided_slice %32 {offsets = [0, 64], sizes = [16, 32], strides = [1, 1]} : vector<16x96xf32> to vector<16x32xf32>
    %45 = vector.extract_strided_slice %34 {offsets = [0, 0], sizes = [8, 128], strides = [1, 1]} : vector<8x256xf32> to vector<8x128xf32>
    %c0_25 = arith.constant 0 : index
    %c0_26 = arith.constant 0 : index
    %46 = vector.load %arg11[%c0_25, %c0_26] : memref<8x128xf32, #tpu.memory_space<vmem>>, vector<8x128xf32>
    %47 = arith.mulf %45, %46 : vector<8x128xf32>
    %48 = vector.extract_strided_slice %34 {offsets = [0, 128], sizes = [8, 128], strides = [1, 1]} : vector<8x256xf32> to vector<8x128xf32>
    %c0_27 = arith.constant 0 : index
    %c0_28 = arith.constant 0 : index
    %49 = vector.load %arg12[%c0_27, %c0_28] : memref<8x128xf32, #tpu.memory_space<vmem>>, vector<8x128xf32>
    %50 = arith.mulf %48, %49 : vector<8x128xf32>
    %51 = arith.addf %47, %50 : vector<8x128xf32>
    %cst_29 = arith.constant 1.000000e+00 : f32
    %52 = vector.broadcast %cst_29 : f32 to vector<8x128xf32>
    %53 = arith.addf %51, %52 : vector<8x128xf32>
    %54 = vector.extract_strided_slice %53 {offsets = [0, 0], sizes = [8, 32], strides = [1, 1]} : vector<8x128xf32> to vector<8x32xf32>
    %55 = vector.extract_strided_slice %53 {offsets = [0, 32], sizes = [8, 32], strides = [1, 1]} : vector<8x128xf32> to vector<8x32xf32>
    %56 = vector.extract_strided_slice %53 {offsets = [0, 64], sizes = [8, 32], strides = [1, 1]} : vector<8x128xf32> to vector<8x32xf32>
    %57 = vector.extract_strided_slice %53 {offsets = [0, 96], sizes = [8, 32], strides = [1, 1]} : vector<8x128xf32> to vector<8x32xf32>
    %58 = vector.shape_cast %54 : vector<8x32xf32> to vector<1x8x32xf32>
    %59 = vector.shape_cast %55 : vector<8x32xf32> to vector<1x8x32xf32>
    %60 = vector.shape_cast %56 : vector<8x32xf32> to vector<1x8x32xf32>
    %61 = vector.shape_cast %57 : vector<8x32xf32> to vector<1x8x32xf32>
    %62 = tpu.concatenate %58, %59, %60, %61 in 0 : vector<1x8x32xf32>, vector<1x8x32xf32>, vector<1x8x32xf32>, vector<1x8x32xf32> -> vector<4x8x32xf32>
    %63 = vector.shape_cast %43 : vector<16x32xf32> to vector<1x16x32xf32>
    %64 = vector.shape_cast %63 : vector<1x16x32xf32> to vector<1x16x32xf32>
    %65 = vector.broadcast %64 : vector<1x16x32xf32> to vector<4x16x32xf32>
    "tpu.trace_start"() <{level = 10 : i32, message = "hqd,hkd->hqk"}> : () -> ()
    %cst_30 = arith.constant dense<0.000000e+00> : vector<4x8x16xf32>
    %66 = tpu.matmul %62, %65, %cst_30 {dimension_numbers = #tpu.dot_dimension_numbers<[2], [2], [1], [1], [0, 0, 0, 1, 1, 1], [0], [0]>} : vector<4x8x32xf32>, vector<4x16x32xf32>, vector<4x8x16xf32> -> vector<4x8x16xf32>
    "tpu.trace_stop"() : () -> ()
    %67 = tpu.iota {dimensions = array<i32: 1>} : vector<4x8x16xi32>
    %68 = vector.broadcast %4 : i32 to vector<4x8x16xi32>
    %69 = arith.addi %67, %68 : vector<4x8x16xi32>
    %70 = tpu.iota {dimensions = array<i32: 2>} : vector<4x8x16xi32>
    %71 = arith.cmpi sge, %69, %70 : vector<4x8x16xi32>
    %cst_31 = arith.constant -1.000000e+09 : f32
    %72 = vector.broadcast %cst_31 : f32 to vector<4x8x16xf32>
    %73 = arith.select %71, %66, %72 : vector<4x8x16xi1>, vector<4x8x16xf32>
    %cst_32 = arith.constant 3.200000e+01 : f32
    %74 = vector.broadcast %cst_32 : f32 to vector<4x8x16xf32>
    %75 = arith.cmpf one, %73, %74 : vector<4x8x16xf32>
    %cst_33 = arith.constant 0xFF800000 : f32
    %76 = vector.broadcast %cst_33 : f32 to vector<4x8x16xf32>
    %77 = arith.select %75, %73, %76 : vector<4x8x16xi1>, vector<4x8x16xf32>
    %cst_34 = arith.constant 1.000000e+00 : f32
    %78 = vector.broadcast %cst_34 : f32 to vector<4x8x16xf32>
    %79 = arith.subf %77, %78 : vector<4x8x16xf32>
    %cst_35 = arith.constant 0.176776692 : f32
    %80 = vector.broadcast %cst_35 : f32 to vector<4x8x16xf32>
    %81 = arith.mulf %79, %80 : vector<4x8x16xf32>
    %cst_36 = arith.constant dense<0xFF800000> : vector<4x8xf32>
    %82 = vector.multi_reduction <maximumf>, %81, %cst_36 [2] : vector<4x8x16xf32> to vector<4x8xf32>
    %83 = vector.shape_cast %82 : vector<4x8xf32> to vector<4x8x1xf32>
    %cst_37 = arith.constant -3.000000e+38 : f32
    %84 = vector.broadcast %cst_37 : f32 to vector<4x8x1xf32>
    %85 = arith.maximumf %83, %84 : vector<4x8x1xf32>
    %86 = vector.broadcast %85 : vector<4x8x1xf32> to vector<4x8x16xf32>
    %87 = arith.subf %81, %86 : vector<4x8x16xf32>
    %88 = math.exp %87 : vector<4x8x16xf32>
    %cst_38 = arith.constant dense<0.000000e+00> : vector<4x8xf32>
    %89 = vector.multi_reduction <add>, %88, %cst_38 [2] : vector<4x8x16xf32> to vector<4x8xf32>
    %90 = vector.shape_cast %89 : vector<4x8xf32> to vector<4x8x1xf32>
    %cst_39 = arith.constant 0.000000e+00 : f32
    %91 = vector.broadcast %cst_39 : f32 to vector<4x8x1xf32>
    %92 = arith.cmpf oeq, %90, %91 : vector<4x8x1xf32>
    %93 = tpu.reciprocal %90 {approx = true} : vector<4x8x1xf32> -> vector<4x8x1xf32>
    %cst_40 = arith.constant 0.000000e+00 : f32
    %94 = vector.broadcast %cst_40 : f32 to vector<4x8x1xf32>
    %95 = arith.select %92, %94, %93 : vector<4x8x1xi1>, vector<4x8x1xf32>
    %96 = vector.broadcast %95 : vector<4x8x1xf32> to vector<4x8x16xf32>
    %97 = arith.mulf %88, %96 : vector<4x8x16xf32>
    %98 = vector.shape_cast %44 : vector<16x32xf32> to vector<1x16x32xf32>
    %99 = vector.shape_cast %98 : vector<1x16x32xf32> to vector<1x16x32xf32>
    %100 = vector.broadcast %99 : vector<1x16x32xf32> to vector<4x16x32xf32>
    "tpu.trace_start"() <{level = 10 : i32, message = "hqk,hkd->hqd"}> : () -> ()
    %cst_41 = arith.constant dense<0.000000e+00> : vector<4x8x32xf32>
    %101 = tpu.matmul %97, %100, %cst_41 {dimension_numbers = #tpu.dot_dimension_numbers<[2], [1], [1], [2], [0, 0, 0, 1, 1, 2], [0], [0]>} : vector<4x8x16xf32>, vector<4x16x32xf32>, vector<4x8x32xf32> -> vector<4x8x32xf32>
    "tpu.trace_stop"() : () -> ()
    %c0_42 = arith.constant 0 : index
    %c0_43 = arith.constant 0 : index
    %c0_44 = arith.constant 0 : index
    %102 = vector.load %arg7[%c0_42, %c0_43, %c0_44] : memref<4x32x128xf32, #tpu.memory_space<vmem>>, vector<4x32x128xf32>
    "tpu.trace_start"() <{level = 10 : i32, message = "hqd,hde->hqe"}> : () -> ()
    %cst_45 = arith.constant dense<0.000000e+00> : vector<4x8x128xf32>
    %103 = tpu.matmul %101, %102, %cst_45 {dimension_numbers = #tpu.dot_dimension_numbers<[2], [1], [1], [2], [0, 0, 0, 1, 1, 2], [0], [0]>} : vector<4x8x32xf32>, vector<4x32x128xf32>, vector<4x8x128xf32> -> vector<4x8x128xf32>
    "tpu.trace_stop"() : () -> ()
    %cst_46 = arith.constant dense<0.000000e+00> : vector<8x128xf32>
    %104 = vector.multi_reduction <add>, %103, %cst_46 [0] : vector<4x8x128xf32> to vector<8x128xf32>
    %105 = arith.addf %1, %104 : vector<8x128xf32>
    %106 = arith.mulf %105, %105 : vector<8x128xf32>
    %cst_47 = arith.constant dense<0.000000e+00> : vector<8xf32>
    %107 = vector.multi_reduction <add>, %106, %cst_47 [1] : vector<8x128xf32> to vector<8xf32>
    %108 = vector.shape_cast %107 : vector<8xf32> to vector<8x1xf32>
    %cst_48 = arith.constant 1.280000e+02 : f32
    %109 = vector.broadcast %cst_48 : f32 to vector<8x1xf32>
    %110 = arith.divf %108, %109 : vector<8x1xf32>
    %cst_49 = arith.constant 9.99999974E-6 : f32
    %111 = vector.broadcast %cst_49 : f32 to vector<8x1xf32>
    %112 = arith.addf %110, %111 : vector<8x1xf32>
    %113 = math.rsqrt %112 : vector<8x1xf32>
    %114 = vector.broadcast %113 : vector<8x1xf32> to vector<8x128xf32>
    %115 = arith.mulf %105, %114 : vector<8x128xf32>
    %c0_50 = arith.constant 0 : index
    %c0_51 = arith.constant 0 : index
    %116 = vector.load %arg8[%c0_50, %c0_51] : memref<1x128xf32, #tpu.memory_space<vmem>>, vector<1x128xf32>
    %117 = vector.broadcast %116 : vector<1x128xf32> to vector<8x128xf32>
    %118 = arith.mulf %115, %117 : vector<8x128xf32>
    %c0_52 = arith.constant 0 : index
    %c0_53 = arith.constant 0 : index
    %119 = vector.load %arg9[%c0_52, %c0_53] : memref<128x512xf32, #tpu.memory_space<vmem>>, vector<128x512xf32>
    %cst_54 = arith.constant dense<0.000000e+00> : vector<8x512xf32>
    %120 = tpu.matmul %118, %119, %cst_54 {dimension_numbers = #tpu.dot_dimension_numbers<[1], [0], [0], [1], [0, 0, 1, 1], [], []>} : vector<8x128xf32>, vector<128x512xf32>, vector<8x512xf32> -> vector<8x512xf32>
    %121 = vector.extract_strided_slice %120 {offsets = [0, 0], sizes = [8, 256], strides = [1, 1]} : vector<8x512xf32> to vector<8x256xf32>
    %122 = vector.extract_strided_slice %120 {offsets = [0, 256], sizes = [8, 256], strides = [1, 1]} : vector<8x512xf32> to vector<8x256xf32>
    %cst_55 = arith.constant 0.000000e+00 : f32
    %123 = vector.broadcast %cst_55 : f32 to vector<8x256xf32>
    %124 = arith.subf %123, %121 : vector<8x256xf32>
    %125 = math.exp %124 : vector<8x256xf32>
    %cst_56 = arith.constant 1.000000e+00 : f32
    %126 = vector.broadcast %cst_56 : f32 to vector<8x256xf32>
    %127 = arith.addf %126, %125 : vector<8x256xf32>
    %128 = tpu.reciprocal %127 {approx = true} : vector<8x256xf32> -> vector<8x256xf32>
    %129 = arith.mulf %121, %128 : vector<8x256xf32>
    %130 = arith.mulf %129, %122 : vector<8x256xf32>
    %c0_57 = arith.constant 0 : index
    %c0_58 = arith.constant 0 : index
    %131 = vector.load %arg10[%c0_57, %c0_58] : memref<256x128xf32, #tpu.memory_space<vmem>>, vector<256x128xf32>
    %cst_59 = arith.constant dense<0.000000e+00> : vector<8x128xf32>
    %132 = tpu.matmul %130, %131, %cst_59 {dimension_numbers = #tpu.dot_dimension_numbers<[1], [0], [0], [1], [0, 0, 1, 1], [], []>} : vector<8x256xf32>, vector<256x128xf32>, vector<8x128xf32> -> vector<8x128xf32>
    %133 = arith.addf %105, %132 : vector<8x128xf32>
    %c0_60 = arith.constant 0 : index
    %c0_61 = arith.constant 0 : index
    %c0_62 = arith.constant 0 : index
    %134 = vector.load %arg15[%c0_60, %c0_61, %c0_62] : memref<1x8x128xf32, #tpu.memory_space<vmem>>, vector<1x8x128xf32>
    %135 = vector.shape_cast %134 : vector<1x8x128xf32> to vector<8x128xf32>
    %136 = vector.shape_cast %133 : vector<8x128xf32> to vector<1x8x128xf32>
    tpu.vector_store %arg15[%c0_60, %c0_61, %c0_62], %136 {strides = array<i32>} : memref<1x8x128xf32, #tpu.memory_space<vmem>>, vector<1x8x128xf32>,
    return
  }
  func.func @transform_0(%arg0: i32, %arg1: i32) -> (i32, i32, i32) {
    %c0_i32 = arith.constant 0 : i32
    %c0_i32_0 = arith.constant 0 : i32
    return %arg0, %arg1, %c0_i32 : i32, i32, i32
  }
  func.func @transform_1(%arg0: i32, %arg1: i32) -> (i32, i32, i32) {
    %c0_i32 = arith.constant 0 : i32
    %c0_i32_0 = arith.constant 0 : i32
    %c0_i32_1 = arith.constant 0 : i32
    return %arg0, %c0_i32, %c0_i32_0 : i32, i32, i32
  }
  func.func @transform_2(%arg0: i32, %arg1: i32) -> (i32, i32) {
    %c0_i32 = arith.constant 0 : i32
    %c0_i32_0 = arith.constant 0 : i32
    %c0_i32_1 = arith.constant 0 : i32
    return %c0_i32, %c0_i32_0 : i32, i32
  }
  func.func @transform_3(%arg0: i32, %arg1: i32) -> (i32, i32) {
    %c0_i32 = arith.constant 0 : i32
    %c0_i32_0 = arith.constant 0 : i32
    %c0_i32_1 = arith.constant 0 : i32
    return %c0_i32, %c0_i32_0 : i32, i32
  }
  func.func @transform_4(%arg0: i32, %arg1: i32) -> (i32, i32) {
    %c0_i32 = arith.constant 0 : i32
    %c0_i32_0 = arith.constant 0 : i32
    %c0_i32_1 = arith.constant 0 : i32
    return %c0_i32, %c0_i32_0 : i32, i32
  }
  func.func @transform_5(%arg0: i32, %arg1: i32) -> (i32, i32, i32) {
    %c0_i32 = arith.constant 0 : i32
    %c0_i32_0 = arith.constant 0 : i32
    %c0_i32_1 = arith.constant 0 : i32
    %c0_i32_2 = arith.constant 0 : i32
    return %c0_i32, %c0_i32_0, %c0_i32_1 : i32, i32, i32
  }
  func.func @transform_6(%arg0: i32, %arg1: i32) -> (i32, i32) {
    %c0_i32 = arith.constant 0 : i32
    %c0_i32_0 = arith.constant 0 : i32
    %c0_i32_1 = arith.constant 0 : i32
    return %c0_i32, %c0_i32_0 : i32, i32
  }
  func.func @transform_7(%arg0: i32, %arg1: i32) -> (i32, i32) {
    %c0_i32 = arith.constant 0 : i32
    %c0_i32_0 = arith.constant 0 : i32
    %c0_i32_1 = arith.constant 0 : i32
    return %c0_i32, %c0_i32_0 : i32, i32
  }
  func.func @transform_8(%arg0: i32, %arg1: i32) -> (i32, i32) {
    %c0_i32 = arith.constant 0 : i32
    %c0_i32_0 = arith.constant 0 : i32
    %c0_i32_1 = arith.constant 0 : i32
    return %c0_i32, %c0_i32_0 : i32, i32
  }
  func.func @transform_9(%arg0: i32, %arg1: i32) -> (i32, i32) {
    %c0_i32 = arith.constant 0 : i32
    %c0_i32_0 = arith.constant 0 : i32
    return %arg1, %c0_i32 : i32, i32
  }
  func.func @transform_10(%arg0: i32, %arg1: i32) -> (i32, i32) {
    %c0_i32 = arith.constant 0 : i32
    %c0_i32_0 = arith.constant 0 : i32
    return %arg1, %c0_i32 : i32, i32
  }
  func.func @transform_11(%arg0: i32, %arg1: i32) -> (i32, i32) {
    %c0_i32 = arith.constant 0 : i32
    %c0_i32_0 = arith.constant 0 : i32
    %c0_i32_1 = arith.constant 0 : i32
    return %c0_i32, %c0_i32_0 : i32, i32
  }
  func.func @transform_12(%arg0: i32, %arg1: i32) -> (i32, i32) {
    %c0_i32 = arith.constant 0 : i32
    %c0_i32_0 = arith.constant 0 : i32
    %c0_i32_1 = arith.constant 0 : i32
    return %c0_i32, %c0_i32_0 : i32, i32
  }
  func.func @transform_13(%arg0: i32, %arg1: i32) -> (i32, i32, i32) {
    %c0_i32 = arith.constant 0 : i32
    %c0_i32_0 = arith.constant 0 : i32
    return %arg0, %arg1, %c0_i32 : i32, i32, i32
  }
}

</mosaic_0001>

<bundles_post_ra>
// kernel: tpu_custom_call.1
= control target key start
LH: loop header
LB: loop body
LE: loop exit
PB: predicated region body
PF: predicated region fallthrough
CT: control target
= control target key end

     0   :  { %s3524_s0 = inlined_call_operand.vmem [shape: f32[2,16,128], index: 0, kind: input, shape index: {}]   ;;  %s3525_s1 = inlined_call_operand.vmem [shape: f32[2,16,128], index: 1, kind: input, shape index: {}]   ;;  %s3526_s2 = inlined_call_operand.vmem [shape: f32[1,128], index: 2, kind: input, shape index: {}]   ;;  %s3527_s3 = inlined_call_operand.hbm [shape: f32[128,256], index: 3, kind: input, shape index: {}]   ;;  %s3528_s4 = inlined_call_operand.vmem [shape: f32[128,96], index: 4, kind: input, shape index: {}]   ;;  %s3529_s5 = inlined_call_operand.vmem [shape: f32[4,32,128], index: 5, kind: input, shape index: {}]   ;;  %s3530_s6 = inlined_call_operand.vmem [shape: f32[1,128], index: 6, kind: input, shape index: {}]   ;;  %s3531_s7 = inlined_call_operand.hbm [shape: f32[128,512], index: 7, kind: input, shape index: {}]   ;;  %s3532_s8 = inlined_call_operand.hbm [shape: f32[256,128], index: 8, kind: input, shape index: {}]   ;;  %s3533_s9 = inlined_call_operand.vmem [shape: f32[16,128], index: 9, kind: input, shape index: {}]   ;;  %s3534_s10 = inlined_call_operand.vmem [shape: f32[16,128], index: 10, kind: input, shape index: {}]   ;;  %s3535_s11 = inlined_call_operand.vmem [shape: f32[16,32], index: 11, kind: input, shape index: {}]   ;;  %s3536_s12 = inlined_call_operand.hbm [shape: f32[16,32], index: 12, kind: input, shape index: {}]   ;;  %s3537_s13 = inlined_call_operand.hbm [shape: f32[2,16,128], index: 13, kind: output, shape index: {}]  }
   0x1   :  { %3546 = sst [smem:[#allocation23_spill]] %s3527_s3 }
   0x2   :  { %3547 = sst [smem:[#allocation24_spill]] %s3537_s13 }
   0x3   :  { %18 = vsyncpa [#allocation3], 0 }
   0x4   :  { %19 = vsyncpa [#allocation6], 0 }
   0x5   :  { %20 = vsyncpa [#allocation9], 0 }
   0x6   :  { %21 = vsyncpa [#allocation4], 0 }
   0x7   :  { %23 = vsyncpa [#allocation4 + $0x1], 0  ;;  %s3085_s25 = smov 0   ;;  %s3087_s26 = smov 0  }
   0x8   :  { %s3089_s27 = smov 0   ;;  %s3091_s28 = smov 0  }
   0x9   :  { %s3093_s29 = smov 0   ;;  %s3095_s30 = smov 0  }
   0xa   :  { %s3097_s14 = smov 0   ;;  %s3099_s15 = smov 0  }
   0xb LB: > { %3548 = sst [smem:[#allocation15_spill]] %s2969_s25  ;;  %s2349_s16 = sadd.s32 4294967295, %s2997_s15   ;;  %s2997_s15 = sphi %s3099_s15, %s29_s15   ;;  %s2993_s14 = sphi %s3097_s14, %s3570_s14   ;;  %s2989_s30 = sphi %s3095_s30, %s3569_s30   ;;  %s2985_s29 = sphi %s3093_s29, %s3573_s29   ;;  %s2981_s28 = sphi %s3091_s28, %s3567_s28   ;;  %s2977_s27 = sphi %s3089_s27, %s3566_s27   ;;  %s2973_s26 = sphi %s3087_s26, %s3572_s26   ;;  %s2969_s25 = sphi %s3085_s25, %s3571_s25  }
   0xc   : > { %3549 = sst [smem:[#allocation16_spill]] %s2977_s27  ;;  %s2350_s17 = sadd.s32 4294967294, %s2997_s15  }
   0xd   : > { %3550 = sst [smem:[#allocation17_spill]] %s2989_s30  ;;  %s38_s18 = sadd.s32 1, %s2989_s30 }
   0xe   : > { %3551 = sst [smem:[#allocation18_spill]] %s2993_s14  ;;  %s41_s19 = sadd.s32 1, %s2993_s14 }
   0xf   : > { %p39_p0 = scmp.ge.s32.totalorder %s38_s18, 2  ;;  %s345_s20 = sadd.s32 1, %s2977_s27 }
  0x10   : > { %p355_p1 = scmp.ne.s32.totalorder %s2977_s27, %s2973_s26  ;;  %p356_p2 = scmp.eq.s32.totalorder %s2349_s16, 3 }
  0x11   : > { %s3575_s18 = smov (%p39_p0, %s38_s18), 0  ;;  %s3577_s19 = smov (!%p39_p0, %s41_s19), %s2993_s14 }
  0x12   : > { %3552 = sst [smem:[#allocation19_spill]] %s3575_s18  ;;  %s341_s21 = ssub.s32 %s2989_s30, %s3575_s18 }
  0x13   : > { %p3137_p3 = por %p356_p2, %p355_p1  ;;  %p43_p4 = scmp.ge.s32.totalorder %s3577_s19, 2 }
  0x14   : > { %p361_p5 = scmp.ne.s32.totalorder %s2973_s26, %s2969_s25  ;;  %p362_p6 = scmp.eq.s32.totalorder %s2350_s17, 3 }
  0x15   : > { %p2351_p7 = scmp.ge.s32.totalorder %s2997_s15, 1  ;;  %s3579_s19 = smov (%p43_p4, %s3577_s19), 0 }
  0x16   : > { %3554 = sst [smem:[#allocation20_spill]] %s3579_s19  ;;  %p3146_p8 = por %p362_p6, %p361_p5 }
  0x17   : > { %p369_p9 = scmp.lt.s32.totalorder %s2997_s15, 5  ;;  %s340_s24 = ssub.s32 %s2993_s14, %s3579_s19 }
  0x18   : > { %s3555_s23 = scalar_select %p3146_p8, 1, 0 }
  0x19   : > { %s342_s13 = sor.u32 %s341_s21, %s340_s24  ;;  %p3153_p10 = pnand %p2351_p7, %p369_p9 }
  0x1a   : > { %3556 = sst [smem:[#allocation21_spill]] %s3555_s23  ;;  %p343_p11 = scmp.eq.s32.totalorder %s342_s13, 0 }
  0x1b   : > { %p3157_p12 = scmp.eq.s32.totalorder %s2349_s16, 0  ;;  %p2652_p13 = pneg %p3153_p10 }
  0x1c   : > { %s3164_s17 = scalar_select %p343_p11, %s2977_s27, %s345_s20  }
  0x1d   : > { %p3168_p0 = pnand %p3157_p12, %p2652_p13  ;;  %s2999_s21 = smov [#allocation5]  }
  0x1e   : > { %3559 = sst [smem:[#allocation22_spill]] %s3164_s17  ;;  %s406_s24 = sshll.u32 %s2999_s21, 4  ;;  %s407_s24 = int_to_ptr.vmem [resolvable:$true] %s406_s24 }
  0x1f   : > { %p2791_p1 = pneg %p3168_p0  ;;  %s2800_s13 = scalar_lea.vmem %s407_s24, 8192 }
  0x20   : > { %p2801_p2 = scmp.ne.s32.totalorder %s407_s24, %s2800_s13  ;;  %p2808_p6 = scmp.lt.s32.totalorder %s407_s24, %s407_s24 }
  0x21   : > { %p2809_p7 = scmp.lt.s32.totalorder %s2800_s13, %s2800_s13 }
  0x22   : > { %p2803_p4 = pnand %p2801_p2, %p2791_p1 }
  0x23   : > { %p2810_p9 = por %p2809_p7, %p2808_p6 }
  0x24   : > { %p2804_p5 = pneg %p2803_p4 }
  0x26   : > { %p2811_p11 = pnand %p2810_p9, %p2804_p5 }
  0x28   : > { %2814 = shalt.err (!%p2811_p11)
}
  0x29   : > { %s3000_s16 = smov 512   ;;  %s3001_s20 = smov 32  }
  0x2a   : > { %2658 = dma.hbm_to_vmem [thread:$0]  (!%p3168_p0), %s3531_s7, 8192, %s407_s24, [#allocation6], %s3000_s16, %s3000_s16, %s3001_s20  }
  0x2b   : > { %s3002_s14 = smov [#allocation2]  }
  0x2c   : > { %s384_s17 = sshll.u32 %s3002_s14, 4  ;;  %s385_s17 = int_to_ptr.vmem [resolvable:$true] %s384_s17 }
  0x2d   : > { %s2826_s27 = scalar_lea.vmem %s385_s17, 4096  ;;  %p2834_p5 = scmp.lt.s32.totalorder %s385_s17, %s385_s17 }
  0x2e   : > { %p2827_p13 = scmp.ne.s32.totalorder %s385_s17, %s2826_s27  ;;  %p2835_p6 = scmp.lt.s32.totalorder %s2826_s27, %s2826_s27 }
  0x30   : > { %p2829_p2 = pnand %p2827_p13, %p2791_p1  ;;  %p2836_p7 = por %p2835_p6, %p2834_p5 }
  0x32   : > { %p2830_p4 = pneg %p2829_p2 }
  0x34   : > { %p2837_p9 = pnand %p2836_p7, %p2830_p4 }
  0x36   : > { %2840 = shalt.err (!%p2837_p9)
}
  0x37   : > { %s3003_s13 = smov 256   ;;  %s3004_s25 = smov 16  }
  0x38   : > { %s3561_s3 = sld [smem:[#allocation23_spill]]  ;;  %s3005_s14 = smov [#allocation7]  }
  0x39   : > { %s419_s16 = sshll.u32 %s3005_s14, 4  ;;  %s420_s16 = int_to_ptr.vmem [resolvable:$true] %s419_s16 }
  0x3a   : > { %s2852_s20 = scalar_lea.vmem %s420_s16, 4096  ;;  %p2860_p4 = scmp.lt.s32.totalorder %s420_s16, %s420_s16 }
  0x3b   : > { %p2853_p11 = scmp.ne.s32.totalorder %s420_s16, %s2852_s20  ;;  %p2861_p5 = scmp.lt.s32.totalorder %s2852_s20, %s2852_s20 }
  0x3d   : > { %p2855_p13 = pnand %p2853_p11, %p2791_p1  ;;  %p2862_p6 = por %p2861_p5, %p2860_p4 }
  0x3e   : > { %2655 = dma.hbm_to_vmem [thread:$0]  (!%p3168_p0), %s3561_s3, 4096, %s385_s17, [#allocation3], %s3003_s13, %s3003_s13, %s3004_s25  }
  0x3f   : > { %p2856_p2 = pneg %p2855_p13 }
  0x41   : > { %p2863_p7 = pnand %p2862_p6, %p2856_p2 }
  0x43   : > { %2866 = shalt.err (!%p2863_p7)
}
  0x44   : > { %s3006_s27 = smov 128   ;;  %s3007_s21 = smov 8  }
  0x45   : > { %2661 = dma.hbm_to_vmem [thread:$0]  (!%p3168_p0), %s3532_s8, 4096, %s420_s16, [#allocation6], %s3006_s27, %s3006_s27, %s3007_s21  }
  0x46   : > { %s3008_s13 = smov [#allocation8]  }
  0x47   : > { %s435_s19 = sshll.u32 %s3008_s13, 4  ;;  %s436_s19 = int_to_ptr.vmem [resolvable:$true] %s435_s19 }
  0x48   : > { %s2878_s24 = scalar_lea.vmem %s436_s19, 256  ;;  %p2886_p2 = scmp.lt.s32.totalorder %s436_s19, %s436_s19 }
  0x49   : > { %p2879_p9 = scmp.ne.s32.totalorder %s436_s19, %s2878_s24  ;;  %p2887_p4 = scmp.lt.s32.totalorder %s2878_s24, %s2878_s24 }
  0x4b   : > { %p2881_p11 = pnand %p2879_p9, %p2791_p1  ;;  %p2888_p5 = por %p2887_p4, %p2886_p2 }
  0x4d   : > { %p2882_p13 = pneg %p2881_p11 }
  0x4f   : > { %p2889_p6 = pnand %p2888_p5, %p2882_p13 }
  0x51   : > { %2892 = shalt.err (!%p2889_p6)
}
  0x52   : > { %2664 = dma.hbm_to_vmem [thread:$0]  (!%p3168_p0), %s3536_s12, 256, %s436_s19, [#allocation9], %s3006_s27, %s3006_s27, %s3007_s21  }
  0x53   : > { %484 = sbr.rel (%p3153_p10) target bundleno = 2124 (0x84c), region = 72 }
  0x58   : > { %2952 = dma.done.wait (%p3157_p12), [#allocation3], 4096  }
  0x59   : > { %2954 = vsyncadd (%p3157_p12), [#allocation3], 4294963200 }
  0x5a   : > { %2956 = dma.done.wait (%p3157_p12), [#allocation6], 12288  }
  0x5b   : > { %2958 = vsyncadd (%p3157_p12), [#allocation6], 4294955008 }
  0x5c   : > { %2960 = dma.done.wait (%p3157_p12), [#allocation9], 256  }
  0x5d   : > { %2962 = vsyncadd (%p3157_p12), [#allocation9], 4294967040  ;;  %p556_p10 = scmp.lt.s32.totalorder %s2985_s29, 1  ;;  %p558_p0 = scmp.lt.s32.totalorder %s2981_s28, 1  ;;  %v628_v2 = vld [vmem:[%s3528_s4 + $0x78] sm:$0xff]  ;;  %v627_v5 = vld [vmem:[%s3528_s4 + $0x70] sm:$0xff] }
  0x5e   : > { %2499 = vmatprep.subr.mxu0 %v628_v2  ;;  %v626_v7 = vld [vmem:[%s3528_s4 + $0x68] sm:$0xff]  ;;  %v625_v9 = vld [vmem:[%s3528_s4 + $0x60] sm:$0xff]  ;;  %v624_v10 = vld [vmem:[%s3528_s4 + $0x58] sm:$0xff]  ;;  %v3009_v51 = vmov 0.0   ;;  %s3010_s3 = smov 32   ;;  %vm3011_vm0 = vmmov 0  }
  0x5f   : > { %s557_s18 = scalar_select %p556_p10, %s2985_s29, 1  ;;  %2500 = vmatpush3.msra.mxu0 %v628_v2  ;;  %v735_v11 = vld [vmem:[#allocation2 + $0xf8] sm:$0xff]  ;;  %v734_v12 = vld [vmem:[#allocation2 + $0xf0] sm:$0xff]  ;;  %v733_v14 = vld [vmem:[#allocation2 + $0xe8] sm:$0xff]  ;;  %800 = vmatprep.mubr.f32.mxu1 %v3009_v51  ;;  %vm848_vm1 = vcmask 261120   ;;  %vm1170_vm4 = vcmask 130048  }
  0x60   : > { %s3224_s23 = scalar_select %p558_p0, %s2981_s28, 1  ;;  %2501 = vmatprep.subr.mxu0 %v627_v5  ;;  %736 = vmatprep.subr.mxu1 %v735_v11  ;;  %v623_v13 = vld [vmem:[%s3528_s4 + $0x50] sm:$0xff]  ;;  %v732_v15 = vld [vmem:[#allocation2 + $0xe0] sm:$0xff]  ;;  %v622_v16 = vld [vmem:[%s3528_s4 + $0x48] sm:$0xff] }
  0x61   : > { %s2401_s16 = sshll.u32 %s557_s18, 4  ;;  %s2363_s27 = sshll.u32 %s557_s18, 1  ;;  %2502 = vmatpush3.msra.mxu0 %v627_v5  ;;  %737 = vmatpush1.msra.mxu1 %v734_v12  ;;  %v731_v17 = vld [vmem:[#allocation2 + $0xd8] sm:$0xff]  ;;  %v730_v18 = vld [vmem:[#allocation2 + $0xd0] sm:$0xff]  ;;  %v621_v19 = vld [vmem:[%s3528_s4 + $0x40] sm:$0xff] }
  0x62   : > { %s568_s17 = scalar_lea.vmem %s3525_s1, %s2401_s16  ;;  %s561_s13 = sadd.s32 %s2363_s27, %s3224_s23  ;;  %2503 = vmatprep.subr.mxu0 %v626_v7  ;;  %738 = vmatprep.subr.mxu1 %v733_v14  ;;  %v729_v20 = vld [vmem:[#allocation2 + $0xc8] sm:$0xff]  ;;  %v728_v21 = vld [vmem:[#allocation2 + $0xc0] sm:$0xff]  ;;  %v620_v22 = vld [vmem:[%s3528_s4 + $0x38] sm:$0xff] }
  0x63   : > { %s2364_s19 = sshll.u32 %s561_s13, 3  ;;  %v3230_v0 = vld [vmem:[%s568_s17] sm:$0xff]  ;;  %v3232_v1 = vld [vmem:[%s568_s17 + $0x8] sm:$0xff]  ;;  %2504 = vmatpush3.msra.mxu0 %v626_v7  ;;  %739 = vmatpush1.msra.mxu1 %v732_v15  ;;  %v727_v23 = vld [vmem:[#allocation2 + $0xb8] sm:$0xff]  ;;  %s2367_s13 = sshll.u32 %s3224_s23, 3 }
  0x64   : > { %s563_s14 = scalar_lea.vmem %s3524_s0, %s2364_s19  ;;  %v581_v3 = vmul.f32 %v3230_v0, %v3230_v0  ;;  %v582_v8 = vmul.f32 %v3232_v1, %v3232_v1  ;;  %2505 = vmatprep.subr.mxu0 %v625_v9  ;;  %740 = vmatprep.subr.mxu1 %v731_v17  ;;  %v726_v24 = vld [vmem:[#allocation2 + $0xb0] sm:$0xff]  ;;  %v725_v26 = vld [vmem:[#allocation2 + $0xa8] sm:$0xff]  ;;  %v724_v27 = vld [vmem:[#allocation2 + $0xa0] sm:$0xff]  ;;  %s572_s24 = scalar_lea.vmem %s3533_s9, %s2367_s13 }
  0x65   : > { %v3242_v4 = vld [vmem:[%s563_s14] sm:$0xff]  ;;  %2506 = vmatpush3.msra.mxu0 %v625_v9  ;;  %741 = vmatpush1.msra.mxu1 %v730_v18  ;;  %v619_v25 = vld [vmem:[%s3528_s4 + $0x30] sm:$0xff]  ;;  %v618_v28 = vld [vmem:[%s3528_s4 + $0x28] sm:$0xff]  ;;  %s576_s18 = scalar_lea.vmem %s3534_s10, %s2367_s13  ;;  %s3012_s23 = smov 96  }
  0x66   : > { %v605_v6 = vmul.f32 %v3242_v4, %v3242_v4  ;;  %583 = vadd.xlane.f32.xlu0 %v581_v3  ;;  %2507 = vmatprep.subr.mxu0 %v624_v10  ;;  %v723_v29 = vld [vmem:[#allocation2 + $0x98] sm:$0xff]  ;;  %v722_v30 = vld [vmem:[#allocation2 + $0x90] sm:$0xff]  ;;  %v617_v31 = vld [vmem:[%s3528_s4 + $0x20] sm:$0xff]  ;;  %s3013_s16 = smov 64   ;;  %s3562_s19 = sld [smem:[#allocation24_spill]] }
  0x67   : > { %2508 = vmatpush3.msra.mxu0 %v624_v10  ;;  %742 = vmatprep.subr.mxu1 %v729_v20  ;;  %v721_v32 = vld [vmem:[#allocation2 + $0x88] sm:$0xff]  ;;  %v720_v33 = vld [vmem:[#allocation2 + $0x80] sm:$0xff]  ;;  %v616_v34 = vld [vmem:[%s3528_s4 + $0x18] sm:$0xff] }
  0x68   : > { %606 = vadd.xlane.f32.xlu1 %v605_v6  ;;  %2509 = vmatprep.subr.mxu0 %v623_v13  ;;  %v719_v35 = vld [vmem:[#allocation2 + $0x78] sm:$0xff]  ;;  %v718_v36 = vld [vmem:[#allocation2 + $0x70] sm:$0xff]  ;;  %v717_v38 = vld [vmem:[#allocation2 + $0x68] sm:$0xff] }
  0x69   : > { %2510 = vmatpush3.msra.mxu0 %v623_v13  ;;  %743 = vmatpush1.msra.mxu1 %v728_v21  ;;  %v615_v37 = vld [vmem:[%s3528_s4 + $0x10] sm:$0xff]  ;;  %v716_v39 = vld [vmem:[#allocation2 + $0x60] sm:$0xff]  ;;  %v614_v40 = vld [vmem:[%s3528_s4 + $0x8] sm:$0xff] }
  0x6a   : > { %585 = vadd.xlane.f32.xlu0 %v582_v8  ;;  %2511 = vmatprep.subr.mxu0 %v622_v16  ;;  %v715_v41 = vld [vmem:[#allocation2 + $0x58] sm:$0xff]  ;;  %v714_v42 = vld [vmem:[#allocation2 + $0x50] sm:$0xff]  ;;  %v613_v43 = vld [vmem:[%s3528_s4] sm:$0xff] }
  0x6b   : > { %2512 = vmatpush3.msra.mxu0 %v622_v16  ;;  %744 = vmatprep.subr.mxu1 %v727_v23  ;;  %v713_v44 = vld [vmem:[#allocation2 + $0x48] sm:$0xff]  ;;  %v712_v45 = vld [vmem:[#allocation2 + $0x40] sm:$0xff]  ;;  %v711_v46 = vld [vmem:[#allocation2 + $0x38] sm:$0xff] }
  0x6c   : > { %2513 = vmatprep.subr.mxu0 %v621_v19  ;;  %745 = vmatpush1.msra.mxu1 %v726_v24  ;;  %v710_v47 = vld [vmem:[#allocation2 + $0x30] sm:$0xff]  ;;  %v709_v48 = vld [vmem:[#allocation2 + $0x28] sm:$0xff]  ;;  %v708_v49 = vld [vmem:[#allocation2 + $0x20] sm:$0xff] }
  0x6d   : > { %2514 = vmatpush3.msra.mxu0 %v621_v19  ;;  %746 = vmatprep.subr.mxu1 %v725_v26  ;;  %v707_v50 = vld [vmem:[#allocation2 + $0x18] sm:$0xff]  ;;  %v706_v52 = vld [vmem:[#allocation2 + $0x10] sm:$0xff]  ;;  %v812_v53 = vld [vmem:[#allocation8 + $0x8] sm:$0xff] }
  0x6e   : > { %2515 = vmatprep.subr.mxu0 %v620_v22  ;;  %747 = vmatpush1.msra.mxu1 %v724_v27  ;;  %v811_v54 = vld [vmem:[#allocation8] sm:$0xff]  ;;  %v705_v55 = vld [vmem:[#allocation2 + $0x8] sm:$0xff] }
  0x6f   : > { %2516 = vmatpush3.msra.mxu0 %v620_v22  ;;  %748 = vmatprep.subr.mxu1 %v723_v29  ;;  %v704_v56 = vld [vmem:[#allocation2] sm:$0xff]  ;;  %v808_v27 = vld [vmem:[%s3535_s11 + $0x8] sm:$0xff] }
  0x70   : > { %2517 = vmatprep.subr.mxu0 %v619_v25  ;;  %749 = vmatpush1.msra.mxu1 %v722_v30  ;;  %v2370_v6 = vld [vmem:[%s3526_s2] ss:$0 sm:$0xff] }
  0x71   : > { %2518 = vmatpush3.msra.mxu0 %v619_v25  ;;  %750 = vmatprep.subr.mxu1 %v721_v32  ;;  %v837_v16 = vld [vmem:[%s576_s18] sm:$0xff]  ;;  %s553_s18 = sand.u32 1, %s2973_s26  }
  0x72   : > { %2519 = vmatprep.subr.mxu0 %v618_v28  ;;  %751 = vmatpush1.msra.mxu1 %v720_v33  ;;  %v807_v30 = vld [vmem:[%s3535_s11] sm:$0xff] }
  0x73   : > { %2520 = vmatpush3.msra.mxu0 %v618_v28  ;;  %752 = vmatprep.subr.mxu1 %v719_v35 }
  0x74   : > { %2521 = vmatprep.subr.mxu0 %v617_v31  ;;  %753 = vmatpush1.msra.mxu1 %v718_v36 }
  0x75   : > { %2522 = vmatpush3.msra.mxu0 %v617_v31  ;;  %754 = vmatprep.subr.mxu1 %v717_v38 }
  0x76   : > { %2523 = vmatprep.subr.mxu0 %v616_v34  ;;  %755 = vmatpush1.msra.mxu1 %v716_v39 }
  0x77   : > { %2524 = vmatpush3.msra.mxu0 %v616_v34  ;;  %756 = vmatprep.subr.mxu1 %v715_v41 }
  0x78   : > { %2525 = vmatprep.subr.mxu0 %v615_v37  ;;  %757 = vmatpush1.msra.mxu1 %v714_v42 }
  0x79   : > { %2526 = vmatpush3.msra.mxu0 %v615_v37  ;;  %758 = vmatprep.subr.mxu1 %v713_v44 }
  0x7a   : > { %2527 = vmatprep.subr.mxu0 %v614_v40  ;;  %759 = vmatpush1.msra.mxu1 %v712_v45 }
  0x7b   : > { %2528 = vmatpush3.msra.mxu0 %v614_v40  ;;  %760 = vmatprep.subr.mxu1 %v711_v46  ;;  %v1143_v40 = vlaneseq }
  0x7c   : > { %2529 = vmatprep.subr.mxu0 %v613_v43  ;;  %761 = vmatpush1.msra.mxu1 %v710_v47 }
  0x7d   : > { %2530 = vmatpush3.msra.mxu0 %v613_v43  ;;  %762 = vmatprep.subr.mxu1 %v709_v48  ;;  %v1144_v41 = vshrl.u32 %v1143_v40, 7  ;;  %v1148_v44 = vand.u32 127, %v1143_v40 }
  0x7e   : > { %2562 = vmatprep.subr.mxu0 %v3009_v51  ;;  %763 = vmatpush1.msra.mxu1 %v708_v49 }
  0x7f   : > { %817 = vrot.lane.b32.xlu1 %v812_v53, %s3010_s3  ;;  %764 = vmatprep.subr.mxu1 %v707_v50 }
  0x80   : > { %815 = vrot.lane.b32.xlu0 %v811_v54, %s3010_s3  ;;  %765 = vmatpush1.msra.mxu1 %v706_v52 }
  0x81   : > { %766 = vmatprep.subr.mxu1 %v705_v55 }
  0x82   : > { %767 = vmatpush1.msra.mxu1 %v704_v56 }
  0x83   : > { %2534 = vmatprep.subr.mxu1 %v3009_v51 }
  0xef   : > { %v584_v57 = vpop.xlane.xlu0 %583 }
  0xf0   : > { %v588_v58 = vmul.f32 0.0078125, %v584_v57 }
  0xf1   : > { %v607_v59 = vpop.xlane.xlu1 %606 }
  0xf2   : > { %v608_v60 = vmul.f32 0.0078125, %v607_v59  ;;  %v590_v61 = vadd.f32 1e-05, %v588_v58 }
  0xf3   : > { %v586_v62 = vpop.xlane.xlu0 %585 }
  0xf4   : > { %v609_v63 = vadd.f32 1e-05, %v608_v60  ;;  %2757 = vrsqrt.f32 %v590_v61  ;;  %v589_v2 = vmul.f32 0.0078125, %v586_v62 }
  0xf5   : > { %v818_v17 = vpop.permute.xlu1 %817 }
  0xf6   : > { %2759 = vrsqrt.f32 %v609_v63  ;;  %v591_v3 = vadd.f32 1e-05, %v589_v2 }
  0xf7   : > { %v816_v23 = vpop.permute.xlu0 %815 }
  0xf8   : > { %2761 = vrsqrt.f32 %v591_v3 }
 0x101   : > { %v2758_v5 = vpop.eup %2757 }
 0x102   : > { %v594_v8 = vmul.f32 %v2758_v5, %v3230_v0  ;;  %v835_v0 = vld [vmem:[%s572_s24] sm:$0xff]  ;;  %s2179_s24 = scalar_lea.sflag [#allocation4], %s553_s18 }
 0x103   : > { %v2760_v7 = vpop.eup %2759 }
 0x104   : > { %v611_v9 = vmul.f32 %v2760_v7, %v3242_v4  ;;  %v603_v10 = vmul.f32 %v2370_v6, %v594_v8 }
 0x105   : > { %v2762_v11 = vpop.eup %2761 }
 0x106   : > { %v612_v12 = vmul.f32 %v2370_v6, %v611_v9  ;;  %2531 = vmatprep.mubr.f32.mxu0 %v603_v10  ;;  %v595_v13 = vmul.f32 %v2762_v11, %v3232_v1 }
 0x108   : > { %801 = vmatmul.mubr.f32.vlgmr.msra.gmra.mxu1 %v612_v12  ;;  %v604_v14 = vmul.f32 %v2370_v6, %v595_v13 }
 0x109   : > { %2538 = vmatprep.mubr.msk.f32.mxu1 %vm3011_vm0, %v3009_v51 }
 0x10a   : > { %2532 = vmatmul.mubr.f32.vlgmr.msra.gmra.mxu0 %v604_v14 }
 0x10b   : > { %2566 = vmatprep.mubr.msk.f32.mxu0 %vm3011_vm0, %v3009_v51 }
 0x1c8   : > { %v802_v15 = vpop.f32.mrf.mxu1 }
 0x1c9   : > { %v836_v18 = vmul.f32 %v835_v0, %v802_v15 }
 0x1ca   : > { %v804_v19 = vpop.f32.mrf.mxu1  ;;  %v3315_v1 = vpop.f32.mrf.mxu0 }
 0x1cb   : > { %v838_v20 = vmul.f32 %v837_v16, %v804_v19  ;;  %v822_v21 = vmul.f32 %v3315_v1, %v818_v17  ;;  %v810_v28 = vmul.f32 %v3315_v1, %v808_v27 }
 0x1cc   : > { %v3318_v22 = vpop.f32.mrf.mxu0 }
 0x1cd   : > { %v839_v24 = vadd.f32 %v838_v20, %v836_v18  ;;  %827 = vrot.lane.b32.xlu1 %v822_v21, %s3012_s23  ;;  %v821_v26 = vmul.f32 %v816_v23, %v3318_v22  ;;  %v809_v33 = vmul.f32 %v807_v30, %v3318_v22 }
 0x1cf   : > { %v840_v25 = vadd.f32 1.0, %v839_v24 }
 0x1d1   : > { %844 = vrot.lane.b32.xlu0 %v840_v25, %s3013_s16  ;;  %825 = vrot.lane.b32.xlu1 %v821_v26, %s3012_s23 }
 0x1d5   : > { %842 = vrot.lane.b32.xlu1 %v840_v25, %s3012_s23  ;;  %s2362_s23 = sshll.u32 %s553_s18, 3 }
 0x1d6   : > { %s555_s25 = scalar_lea.vmem [#allocation10], %s2362_s23 }
 0x1d7   : > { %s2194_s17 = sshll.u32 %s555_s25, 4  ;;  %s2195_s17 = int_to_ptr.vmem [resolvable:$true] %s2194_s17 }
 0x1d8   : > { %s2893_s14 = scalar_lea.vmem %s2195_s17, 128 }
 0x1d9   : > { %846 = vrot.lane.b32.xlu1 %v840_v25, %s3010_s3  ;;  %s2369_s3 = sshll.u32 %s2981_s28, 3  ;;  %p2894_p12 = scmp.ne.s32.totalorder %s2195_s17, %s2893_s14 }
 0x1da   : > { %v1145_v42 = vstv %s2369_s3 }
 0x1db   : > { %v1146_v43 = vadd.s32 %v1145_v42, %v1144_v41  ;;  %p2895_p1 = pnand %p2894_p12, %p3137_p3 }
 0x1dd   : > { %vm1149_vm2 = vcmp.ge.s32.totalorder %v1146_v43, %v1148_v44  ;;  %p2896_p7 = pneg %p2895_p1 }
 0x23f   : > { %v828_v29 = vpop.permute.xlu1 %827 }
 0x240   : > { %v832_v31 = vadd.f32 %v828_v29, %v810_v28 }
 0x242   : > { %v834_v32 = vadd.f32 2.0, %v832_v31 }
 0x243   : > { %v826_v34 = vpop.permute.xlu1 %825  ;;  %v845_v38 = vpop.permute.xlu0 %844 }
 0x244   : > { %v831_v35 = vadd.f32 %v826_v34, %v809_v33  ;;  %2535 = vmatpush3.xpose.msk.msra.mxu1 %vm848_vm1, %v834_v32 }
 0x245   : > { %2536 = vmatprep.subr.mxu1 %v3009_v51 }
 0x246   : > { %v833_v36 = vadd.f32 2.0, %v831_v35 }
 0x247   : > { %v843_v37 = vpop.permute.xlu1 %842 }
 0x248   : > { %2537 = vmatpush3.xpose.msk.msra.mxu1 %vm848_vm1, %v833_v36 }
 0x249   : > { %2541 = vmatprep.subr.mxu1 %v3009_v51 }
 0x24b   : > { %2539 = vmatmul.mubr.msk.f32.vlgmr.msra.gmra.mxu1 %vm848_vm1, %v840_v25  ;;  %v847_v39 = vpop.permute.xlu1 %846 }
 0x24c   : > { %2542 = vmatpush3.xpose.msk.msra.mxu1 %vm848_vm1, %v834_v32  ;;  %2545 = vmatprep.mubr.msk.f32.mxu1 %vm3011_vm0, %v3009_v51 }
 0x24d   : > { %2543 = vmatprep.subr.mxu1 %v3009_v51 }
 0x250   : > { %2544 = vmatpush3.xpose.msk.msra.mxu1 %vm848_vm1, %v833_v36 }
 0x251   : > { %2548 = vmatprep.subr.mxu1 %v3009_v51 }
 0x253   : > { %2546 = vmatmul.mubr.msk.f32.vlgmr.msra.gmra.mxu1 %vm848_vm1, %v843_v37 }
 0x254   : > { %2549 = vmatpush3.xpose.msk.msra.mxu1 %vm848_vm1, %v834_v32  ;;  %2552 = vmatprep.mubr.msk.f32.mxu1 %vm3011_vm0, %v3009_v51 }
 0x255   : > { %2550 = vmatprep.subr.mxu1 %v3009_v51 }
 0x258   : > { %2551 = vmatpush3.xpose.msk.msra.mxu1 %vm848_vm1, %v833_v36 }
 0x259   : > { %2555 = vmatprep.subr.mxu1 %v3009_v51 }
 0x25b   : > { %2553 = vmatmul.mubr.msk.f32.vlgmr.msra.gmra.mxu1 %vm848_vm1, %v845_v38 }
 0x25c   : > { %2556 = vmatpush3.xpose.msk.msra.mxu1 %vm848_vm1, %v834_v32  ;;  %2559 = vmatprep.mubr.msk.f32.mxu1 %vm3011_vm0, %v3009_v51 }
 0x25d   : > { %2557 = vmatprep.subr.mxu1 %v3009_v51 }
 0x260   : > { %2558 = vmatpush3.xpose.msk.msra.mxu1 %vm848_vm1, %v833_v36 }
 0x261   : > { %2569 = vmatprep.subr.mxu1 %v3009_v51 }
 0x263   : > { %2560 = vmatmul.mubr.msk.f32.vlgmr.msra.gmra.mxu1 %vm848_vm1, %v847_v39 }
 0x264   : > { %2573 = vmatprep.mubr.msk.f32.mxu1 %vm3011_vm0, %v3009_v51 }
 0x30b   : > { %v923_v45 = vpop.f32.mrf.mxu1 }
 0x30c   : > { %v1150_v46 = vsel %vm1149_vm2, %v923_v45, -1e+09 }
 0x30d   : > { %vm1154_vm3 = vcmp.ne.f32.partialorder %v1150_v46, 32.0  ;;  %v2540_v47 = vpop.f32.mrf.mxu1 }
 0x30e   : > { %v1158_v48 = vsel %vm1154_vm3, %v1150_v46, -inf }
 0x30f   : > { %v2383_v49 = vadd.f32 -1.0, %v1158_v48 }
 0x311   : > { %v1166_v50 = vmul.f32 0.17677669, %v2383_v49 }
 0x313   : > { %v995_v52 = vpop.f32.mrf.mxu1  ;;  %v1171_v53 = vsel %vm1170_vm4, %v1166_v50, -inf }
 0x314   : > { %v1151_v54 = vsel %vm1149_vm2, %v995_v52, -1e+09  ;;  %1172 = vmax.xlane.f32.xlu0 %v1171_v53  ;;  %v1529_v52 = vld [vmem:[%s3529_s5 + $0x10] sm:$0xff] }
 0x315   : > { %vm1155_vm5 = vcmp.ne.f32.partialorder %v1151_v54, 32.0  ;;  %v2547_v55 = vpop.f32.mrf.mxu1 }
 0x316   : > { %v1159_v56 = vsel %vm1155_vm5, %v1151_v54, -inf  ;;  %v1528_v54 = vld [vmem:[%s3529_s5 + $0x8] sm:$0xff] }
 0x317   : > { %v2384_v57 = vadd.f32 -1.0, %v1159_v56 }
 0x319   : > { %v1167_v58 = vmul.f32 0.17677669, %v2384_v57  ;;  %v1534_v57 = vld [vmem:[%s3529_s5 + $0x38] sm:$0xff] }
 0x31b   : > { %v1067_v59 = vpop.f32.mrf.mxu1  ;;  %v1174_v60 = vsel %vm1170_vm4, %v1167_v58, -inf }
 0x31c   : > { %v1152_v61 = vsel %vm1149_vm2, %v1067_v59, -1e+09  ;;  %1175 = vmax.xlane.f32.xlu1 %v1174_v60  ;;  %v1533_v59 = vld [vmem:[%s3529_s5 + $0x30] sm:$0xff]  ;;  %v1532_v60 = vld [vmem:[%s3529_s5 + $0x28] sm:$0xff] }
 0x31d   : > { %vm1156_vm6 = vcmp.ne.f32.partialorder %v1152_v61, 32.0  ;;  %v2554_v62 = vpop.f32.mrf.mxu1 }
 0x31e   : > { %v1160_v63 = vsel %vm1156_vm6, %v1152_v61, -inf  ;;  %v1531_v61 = vld [vmem:[%s3529_s5 + $0x20] sm:$0xff]  ;;  %v1538_v62 = vld [vmem:[%s3529_s5 + $0x58] sm:$0xff] }
 0x31f   : > { %v2385_v2 = vadd.f32 -1.0, %v1160_v63  ;;  %v1542_v63 = vld [vmem:[%s3529_s5 + $0x78] sm:$0xff] }
 0x321   : > { %v1168_v3 = vmul.f32 0.17677669, %v2385_v2 }
 0x323   : > { %v1139_v5 = vpop.f32.mrf.mxu1  ;;  %v1177_v6 = vsel %vm1170_vm4, %v1168_v3, -inf }
 0x324   : > { %v1153_v7 = vsel %vm1149_vm2, %v1139_v5, -1e+09  ;;  %1178 = vmax.xlane.f32.xlu0 %v1177_v6  ;;  %v1537_v5 = vld [vmem:[%s3529_s5 + $0x50] sm:$0xff] }
 0x325   : > { %vm1157_vm7 = vcmp.ne.f32.partialorder %v1153_v7, 32.0  ;;  %v2561_v8 = vpop.f32.mrf.mxu1 }
 0x326   : > { %v1161_v9 = vsel %vm1157_vm7, %v1153_v7, -inf  ;;  %v1541_v8 = vld [vmem:[%s3529_s5 + $0x70] sm:$0xff] }
 0x327   : > { %v2386_v10 = vadd.f32 -1.0, %v1161_v9  ;;  %v1536_v9 = vld [vmem:[%s3529_s5 + $0x48] sm:$0xff] }
 0x329   : > { %v1169_v11 = vmul.f32 0.17677669, %v2386_v10  ;;  %v1540_v10 = vld [vmem:[%s3529_s5 + $0x68] sm:$0xff] }
 0x32b   : > { %v1180_v12 = vsel %vm1170_vm4, %v1169_v11, -inf }
 0x32c   : > { %1181 = vmax.xlane.f32.xlu0 %v1180_v12  ;;  %v1535_v12 = vld [vmem:[%s3529_s5 + $0x40] sm:$0xff] }
 0x39d   : > { %v1173_v13 = vpop.xlane.xlu0 %1172 }
 0x39e   : > { %v1183_v14 = vmax.f32 %v1173_v13, -3e+38  ;;  %v1539_v13 = vld [vmem:[%s3529_s5 + $0x60] sm:$0xff] }
 0x3a0   : > { %v1187_v0 = vsub.f32 %v1166_v50, %v1183_v14  ;;  %v1530_v50 = vld [vmem:[%s3529_s5 + $0x18] sm:$0xff] }
 0x3a2   : > { %v1191_v15 = vmul.f32 1.442695, %v1187_v0 }
 0x3a4   : > { %2763 = vpow2.f32 %v1191_v15 }
 0x3a5   : > { %v1176_v16 = vpop.xlane.xlu1 %1175 }
 0x3a6   : > { %v1184_v17 = vmax.f32 %v1176_v16, -3e+38  ;;  %v1915_v16 = vld [vmem:[#allocation5 + $0x1e8] sm:$0xff] }
 0x3a8   : > { %v1188_v18 = vsub.f32 %v1167_v58, %v1184_v17  ;;  %v1527_v58 = vld [vmem:[%s3529_s5] sm:$0xff]  ;;  %v1917_v17 = vld [vmem:[#allocation5 + $0x1f8] sm:$0xff] }
 0x3aa   : > { %v1193_v19 = vmul.f32 1.442695, %v1188_v18  ;;  %v1914_v18 = vld [vmem:[#allocation5 + $0x1e0] sm:$0xff] }
 0x3ac   : > { %2765 = vpow2.f32 %v1193_v19  ;;  %v1916_v19 = vld [vmem:[#allocation5 + $0x1f0] sm:$0xff] }
 0x3ad   : > { %v1179_v20 = vpop.xlane.xlu0 %1178 }
 0x3ae   : > { %v1185_v21 = vmax.f32 %v1179_v20, -3e+38  ;;  %v1911_v20 = vld [vmem:[#allocation5 + $0x1c8] sm:$0xff] }
 0x3b0   : > { %v1189_v23 = vsub.f32 %v1168_v3, %v1185_v21  ;;  %v1913_v21 = vld [vmem:[#allocation5 + $0x1d8] sm:$0xff] }
 0x3b1   : > { %v2764_v24 = vpop.eup %2763 }
 0x3b2   : > { %v1195_v25 = vmul.f32 1.442695, %v1189_v23  ;;  %v1199_v26 = vsel %vm1170_vm4, %v2764_v24, 0.0  ;;  %v1910_v23 = vld [vmem:[#allocation5 + $0x1c0] sm:$0xff] }
 0x3b3   : > { %1200 = vadd.xlane.f32.xlu0 %v1199_v26  ;;  %v1909_v26 = vld [vmem:[#allocation5 + $0x1b8] sm:$0xff] }
 0x3b4   : > { %2767 = vpow2.f32 %v1195_v25  ;;  %v1907_v25 = vld [vmem:[#allocation5 + $0x1a8] sm:$0xff] }
 0x3b5   : > { %v1182_v27 = vpop.xlane.xlu0 %1181 }
 0x3b6   : > { %v1186_v28 = vmax.f32 %v1182_v27, -3e+38  ;;  %v1906_v27 = vld [vmem:[#allocation5 + $0x1a0] sm:$0xff] }
 0x3b8   : > { %v1190_v29 = vsub.f32 %v1169_v11, %v1186_v28  ;;  %v1908_v28 = vld [vmem:[#allocation5 + $0x1b0] sm:$0xff] }
 0x3b9   : > { %v2766_v30 = vpop.eup %2765 }
 0x3ba   : > { %v1197_v31 = vmul.f32 1.442695, %v1190_v29  ;;  %v1202_v32 = vsel %vm1170_vm4, %v2766_v30, 0.0  ;;  %v1905_v29 = vld [vmem:[#allocation5 + $0x198] sm:$0xff] }
 0x3bb   : > { %1203 = vadd.xlane.f32.xlu1 %v1202_v32  ;;  %v1899_v32 = vld [vmem:[#allocation5 + $0x168] sm:$0xff] }
 0x3bc   : > { %2769 = vpow2.f32 %v1197_v31  ;;  %v1904_v31 = vld [vmem:[#allocation5 + $0x190] sm:$0xff] }
 0x3c1   : > { %v2768_v33 = vpop.eup %2767 }
 0x3c2   : > { %v1205_v34 = vsel %vm1170_vm4, %v2768_v33, 0.0 }
 0x3c3   : > { %1206 = vadd.xlane.f32.xlu0 %v1205_v34  ;;  %v1898_v34 = vld [vmem:[#allocation5 + $0x160] sm:$0xff] }
 0x3c9   : > { %v2770_v35 = vpop.eup %2769 }
 0x3ca   : > { %v1208_v36 = vsel %vm1170_vm4, %v2770_v35, 0.0 }
 0x3cb   : > { %1209 = vadd.xlane.f32.xlu1 %v1208_v36 }
 0x3d9   : > { %1231 = vrot.lane.b32.xlu0 %v3315_v1, %s3013_s16 }
 0x3dc   : > { %1229 = vrot.lane.b32.xlu1 %v3318_v22, %s3013_s16  ;;  %s2397_s16 = sshll.u32 %s2985_s29, 1 }
 0x3dd   : > { %s2190_s27 = sadd.s32 %s2981_s28, %s2397_s16  ;;  %s3014_s28 = smov [#allocation10]  }
 0x3de   : > { %s2398_s21 = sshll.u32 %s2190_s27, 7  ;;  %s2897_s29 = sshll.u32 %s3014_s28, 4  ;;  %s2898_s29 = int_to_ptr.vmem [resolvable:$false] %s2897_s29 }
 0x3df   : > { %s2192_s30 = scalar_lea.hbm %s3562_s19, %s2398_s21  ;;  %s2899_s20 = scalar_lea.vmem %s2898_s29, 256 }
 0x3e0   : > { %p2900_p9 = scmp.lt.s32.totalorder %s2195_s17, %s2898_s29  ;;  %p2901_p11 = scmp.lt.s32.totalorder %s2899_s20, %s2893_s14 }
 0x3e2   : > { %p2902_p13 = por %p2901_p11, %p2900_p9 }
 0x3e4   : > { %p2903_p2 = pnand %p2902_p13, %p2896_p7 }
 0x43c   : > { %v1201_v37 = vpop.xlane.xlu0 %1200 }
 0x43d   : > { %2771 = vrcp.f32 %v1201_v37  ;;  %vm1211_vm8 = vcmp.eq.f32.partialorder %v1201_v37, 0.0 }
 0x444   : > { %v1204_v38 = vpop.xlane.xlu1 %1203 }
 0x445   : > { %2773 = vrcp.f32 %v1204_v38  ;;  %vm1212_vm9 = vcmp.eq.f32.partialorder %v1204_v38, 0.0 }
 0x44a   : > { %v2772_v41 = vpop.eup %2771 }
 0x44b   : > { %v1219_v43 = vsel %vm1211_vm8, 0.0, %v2772_v41 }
 0x44c   : > { %v1207_v39 = vpop.xlane.xlu0 %1206  ;;  %v1223_v44 = vmul.f32 %v2764_v24, %v1219_v43  ;;  %v1912_v24 = vld [vmem:[#allocation5 + $0x1d0] sm:$0xff] }
 0x44d   : > { %2775 = vrcp.f32 %v1207_v39  ;;  %vm1213_vm10 = vcmp.eq.f32.partialorder %v1207_v39, 0.0 }
 0x450   : > { %v1232_v40 = vpop.permute.xlu0 %1231 }
 0x451   : > { %2563 = vmatpush3.msra.mxu0 %v1232_v40  ;;  %2570 = vmatpush3.msra.mxu1 %v1232_v40 }
 0x452   : > { %v2774_v42 = vpop.eup %2773  ;;  %2564 = vmatprep.subr.mxu0 %v3009_v51  ;;  %2571 = vmatprep.subr.mxu1 %v3009_v51 }
 0x453   : > { %v1220_v22 = vsel %vm1212_vm9, 0.0, %v2774_v42 }
 0x454   : > { %v1210_v1 = vpop.xlane.xlu1 %1209  ;;  %v1224_v45 = vmul.f32 %v2766_v30, %v1220_v22  ;;  %v1902_v30 = vld [vmem:[#allocation5 + $0x180] sm:$0xff] }
 0x455   : > { %2777 = vrcp.f32 %v1210_v1  ;;  %vm1214_vm11 = vcmp.eq.f32.partialorder %v1210_v1, 0.0 }
 0x458   : > { %v1230_v46 = vpop.permute.xlu1 %1229 }
 0x459   : > { %2565 = vmatpush3.msra.mxu0 %v1230_v46  ;;  %2572 = vmatpush3.msra.mxu1 %v1230_v46 }
 0x45a   : > { %v2776_v47 = vpop.eup %2775  ;;  %2567 = vmatmul.mubr.msk.f32.vlgmr.msra.gmra.mxu0 %vm1170_vm4, %v1223_v44  ;;  %2574 = vmatmul.mubr.msk.f32.vlgmr.msra.gmra.mxu1 %vm1170_vm4, %v1224_v45 }
 0x45b   : > { %v1221_v48 = vsel %vm1213_vm10, 0.0, %v2776_v47  ;;  %2576 = vmatprep.subr.mxu0 %v3009_v51  ;;  %2583 = vmatprep.subr.mxu1 %v3009_v51  ;;  %v1895_v47 = vld [vmem:[#allocation5 + $0x148] sm:$0xff] }
 0x45c   : > { %v1225_v49 = vmul.f32 %v2768_v33, %v1221_v48  ;;  %2577 = vmatpush3.msra.mxu0 %v1232_v40  ;;  %2584 = vmatpush3.msra.mxu1 %v1232_v40  ;;  %v1901_v33 = vld [vmem:[#allocation5 + $0x178] sm:$0xff] }
 0x45d   : > { %2578 = vmatprep.subr.mxu0 %v3009_v51  ;;  %2585 = vmatprep.subr.mxu1 %v3009_v51  ;;  %v1897_v48 = vld [vmem:[#allocation5 + $0x158] sm:$0xff] }
 0x45e   : > { %2579 = vmatpush3.msra.mxu0 %v1230_v46  ;;  %2580 = vmatprep.mubr.msk.f32.mxu0 %vm3011_vm0, %v3009_v51 }
 0x45f   : > { %2586 = vmatpush3.msra.mxu1 %v1230_v46  ;;  %2581 = vmatmul.mubr.msk.f32.vlgmr.msra.gmra.mxu0 %vm1170_vm4, %v1225_v49  ;;  %v1894_v49 = vld [vmem:[#allocation5 + $0x140] sm:$0xff] }
 0x460   : > { %2587 = vmatprep.mubr.msk.f32.mxu1 %vm3011_vm0, %v3009_v51  ;;  %2590 = vmatprep.subr.mxu0 %v3009_v51 }
 0x461   : > { %2591 = vmatpush3.msra.mxu0 %v1530_v50  ;;  %2601 = vmatprep.subr.mxu1 %v3009_v51  ;;  %v1896_v50 = vld [vmem:[#allocation5 + $0x150] sm:$0xff] }
 0x462   : > { %v2778_v53 = vpop.eup %2777  ;;  %2592 = vmatprep.subr.mxu0 %v3009_v51  ;;  %2598 = vmatprep.mubr.msk.f32.mxu0 %vm3011_vm0, %v3009_v51 }
 0x463   : > { %v1222_v55 = vsel %vm1214_vm11, 0.0, %v2778_v53  ;;  %2593 = vmatpush3.msra.mxu0 %v1529_v52  ;;  %v1891_v52 = vld [vmem:[#allocation5 + $0x128] sm:$0xff]  ;;  %v1893_v53 = vld [vmem:[#allocation5 + $0x138] sm:$0xff] }
 0x464   : > { %v1226_v56 = vmul.f32 %v2770_v35, %v1222_v55  ;;  %2594 = vmatprep.subr.mxu0 %v3009_v51  ;;  %v1900_v35 = vld [vmem:[#allocation5 + $0x170] sm:$0xff] }
 0x465   : > { %2595 = vmatpush3.msra.mxu0 %v1528_v54  ;;  %v1890_v54 = vld [vmem:[#allocation5 + $0x120] sm:$0xff]  ;;  %v1892_v55 = vld [vmem:[#allocation5 + $0x130] sm:$0xff] }
 0x466   : > { %2588 = vmatmul.mubr.msk.f32.vlgmr.msra.gmra.mxu1 %vm1170_vm4, %v1226_v56  ;;  %2596 = vmatprep.subr.mxu0 %v3009_v51  ;;  %v1889_v56 = vld [vmem:[#allocation5 + $0x118] sm:$0xff] }
 0x467   : > { %2602 = vmatpush3.msra.mxu1 %v1534_v57  ;;  %2597 = vmatpush3.msra.mxu0 %v1527_v58  ;;  %v1886_v57 = vld [vmem:[#allocation5 + $0x100] sm:$0xff]  ;;  %v1888_v58 = vld [vmem:[#allocation5 + $0x110] sm:$0xff] }
 0x468   : > { %2603 = vmatprep.subr.mxu1 %v3009_v51  ;;  %2609 = vmatprep.mubr.msk.f32.mxu1 %vm3011_vm0, %v3009_v51 }
 0x469   : > { %2604 = vmatpush3.msra.mxu1 %v1533_v59  ;;  %2612 = vmatprep.subr.mxu0 %v3009_v51  ;;  %v1883_v59 = vld [vmem:[#allocation5 + $0xe8] sm:$0xff] }
 0x46a   : > { %2605 = vmatprep.subr.mxu1 %v3009_v51 }
 0x46b   : > { %2606 = vmatpush3.msra.mxu1 %v1532_v60  ;;  %v1885_v60 = vld [vmem:[#allocation5 + $0xf8] sm:$0xff] }
 0x46c   : > { %2607 = vmatprep.subr.mxu1 %v3009_v51 }
 0x46d   : > { %2608 = vmatpush3.msra.mxu1 %v1531_v61  ;;  %v1882_v61 = vld [vmem:[#allocation5 + $0xe0] sm:$0xff] }
 0x46e   : > { %2623 = vmatprep.subr.mxu1 %v3009_v51 }
 0x51a   : > { %v1304_v2 = vpop.f32.mrf.mxu0  ;;  %v1377_v3 = vpop.f32.mrf.mxu1 }
 0x51b   : > { %2599 = vmatmul.mubr.msk.f32.vlgmr.msra.gmra.mxu0 %vm848_vm1, %v1304_v2  ;;  %2610 = vmatmul.mubr.msk.f32.vlgmr.msra.gmra.mxu1 %vm848_vm1, %v1377_v3  ;;  %v1881_v2 = vld [vmem:[#allocation5 + $0xd8] sm:$0xff]  ;;  %v1878_v3 = vld [vmem:[#allocation5 + $0xc0] sm:$0xff] }
 0x51c   : > { %2613 = vmatpush3.msra.mxu0 %v1538_v62  ;;  %v2568_v6 = vpop.f32.mrf.mxu0  ;;  %v2575_v7 = vpop.f32.mrf.mxu1  ;;  %2624 = vmatpush3.msra.mxu1 %v1542_v63  ;;  %v1884_v62 = vld [vmem:[#allocation5 + $0xf0] sm:$0xff]  ;;  %v1879_v63 = vld [vmem:[#allocation5 + $0xc8] sm:$0xff] }
 0x51d   : > { %2614 = vmatprep.subr.mxu0 %v3009_v51  ;;  %2620 = vmatprep.mubr.msk.f32.mxu0 %vm3011_vm0, %v3009_v51  ;;  %v1875_v6 = vld [vmem:[#allocation5 + $0xa8] sm:$0xff]  ;;  %v1877_v7 = vld [vmem:[#allocation5 + $0xb8] sm:$0xff] }
 0x51e   : > { %2615 = vmatpush3.msra.mxu0 %v1537_v5  ;;  %2625 = vmatprep.subr.mxu1 %v3009_v51  ;;  %v1880_v5 = vld [vmem:[#allocation5 + $0xd0] sm:$0xff] }
 0x51f   : > { %v1450_v11 = vpop.f32.mrf.mxu0  ;;  %2616 = vmatprep.subr.mxu0 %v3009_v51  ;;  %2626 = vmatpush3.msra.mxu1 %v1541_v8  ;;  %v1874_v8 = vld [vmem:[#allocation5 + $0xa0] sm:$0xff] }
 0x520   : > { %2617 = vmatpush3.msra.mxu0 %v1536_v9  ;;  %2627 = vmatprep.subr.mxu1 %v3009_v51  ;;  %v1876_v9 = vld [vmem:[#allocation5 + $0xb0] sm:$0xff] }
 0x521   : > { %v2582_v14 = vpop.f32.mrf.mxu0  ;;  %2618 = vmatprep.subr.mxu0 %v3009_v51  ;;  %2628 = vmatpush3.msra.mxu1 %v1540_v10  ;;  %v1871_v10 = vld [vmem:[#allocation5 + $0x88] sm:$0xff] }
 0x522   : > { %2619 = vmatpush3.msra.mxu0 %v1535_v12  ;;  %2629 = vmatprep.subr.mxu1 %v3009_v51  ;;  %v1870_v12 = vld [vmem:[#allocation5 + $0x80] sm:$0xff]  ;;  %v1867_v14 = vld [vmem:[#allocation5 + $0x68] sm:$0xff] }
 0x523   : > { %2621 = vmatmul.mubr.msk.f32.vlgmr.msra.gmra.mxu0 %vm848_vm1, %v1450_v11  ;;  %2630 = vmatpush3.msra.mxu1 %v1539_v13  ;;  %v1873_v11 = vld [vmem:[#allocation5 + $0x98] sm:$0xff]  ;;  %v1872_v13 = vld [vmem:[#allocation5 + $0x90] sm:$0xff] }
 0x524   : > { %2631 = vmatprep.mubr.msk.f32.mxu1 %vm3011_vm0, %v3009_v51  ;;  %1982 = vmatprep.mubr.f32.mxu0 %v3009_v51 }
 0x525   : > { %1918 = vmatprep.subr.mxu0 %v1915_v16  ;;  %1989 = vmatprep.subr.mxu1 %v1917_v17  ;;  %v1868_v16 = vld [vmem:[#allocation5 + $0x70] sm:$0xff]  ;;  %v1863_v17 = vld [vmem:[#allocation5 + $0x48] sm:$0xff] }
 0x526   : > { %v1523_v0 = vpop.f32.mrf.mxu1  ;;  %1919 = vmatpush1.msra.mxu0 %v1914_v18  ;;  %v1865_v18 = vld [vmem:[#allocation5 + $0x58] sm:$0xff] }
 0x527   : > { %2632 = vmatmul.mubr.msk.f32.vlgmr.msra.gmra.mxu1 %vm848_vm1, %v1523_v0  ;;  %1920 = vmatprep.subr.mxu0 %v1911_v20  ;;  %v1869_v0 = vld [vmem:[#allocation5 + $0x78] sm:$0xff]  ;;  %v1864_v20 = vld [vmem:[#allocation5 + $0x50] sm:$0xff] }
 0x528   : > { %v2589_v15 = vpop.f32.mrf.mxu1  ;;  %2053 = vmatprep.mubr.f32.mxu1 %v3009_v51  ;;  %1990 = vmatpush1.msra.mxu1 %v1916_v19  ;;  %v1903_v51 = vld [vmem:[#allocation5 + $0x188] sm:$0xff]  ;;  %v1862_v19 = vld [vmem:[#allocation5 + $0x40] sm:$0xff] }
 0x529   : > { %1991 = vmatprep.subr.mxu1 %v1913_v21  ;;  %1921 = vmatpush1.msra.mxu0 %v1910_v23  ;;  %v1866_v15 = vld [vmem:[#allocation5 + $0x60] sm:$0xff]  ;;  %v1859_v21 = vld [vmem:[#allocation5 + $0x28] sm:$0xff]  ;;  %v1861_v23 = vld [vmem:[#allocation5 + $0x38] sm:$0xff] }
 0x52a   : > { %1992 = vmatpush1.msra.mxu1 %v1912_v24  ;;  %1922 = vmatprep.subr.mxu0 %v1907_v25  ;;  %v1858_v24 = vld [vmem:[#allocation5 + $0x20] sm:$0xff]  ;;  %v1860_v25 = vld [vmem:[#allocation5 + $0x30] sm:$0xff] }
 0x52b   : > { %1993 = vmatprep.subr.mxu1 %v1909_v26  ;;  %1923 = vmatpush1.msra.mxu0 %v1906_v27  ;;  %v1855_v26 = vld [vmem:[#allocation5 + $0x8] sm:$0xff]  ;;  %v1857_v27 = vld [vmem:[#allocation5 + $0x18] sm:$0xff] }
 0x52c   : > { %1994 = vmatpush1.msra.mxu1 %v1908_v28  ;;  %1924 = vmatprep.subr.mxu0 %v1903_v51  ;;  %v1854_v28 = vld [vmem:[#allocation5] sm:$0xff]  ;;  %v1856_v51 = vld [vmem:[#allocation5 + $0x10] sm:$0xff] }
 0x52d   : > { %1995 = vmatprep.subr.mxu1 %v1905_v29  ;;  %1925 = vmatpush1.msra.mxu0 %v1902_v30 }
 0x52e   : > { %1996 = vmatpush1.msra.mxu1 %v1904_v31  ;;  %1926 = vmatprep.subr.mxu0 %v1899_v32 }
 0x52f   : > { %1997 = vmatprep.subr.mxu1 %v1901_v33  ;;  %1927 = vmatpush1.msra.mxu0 %v1898_v34  ;;  %v2395_v33 = vld [vmem:[%s3530_s6] ss:$0 sm:$0xff] }
 0x530   : > { %1998 = vmatpush1.msra.mxu1 %v1900_v35  ;;  %1928 = vmatprep.subr.mxu0 %v1895_v47  ;;  %v2099_v47 = vld [vmem:[#allocation7 + $0xc8] sm:$0xff] }
 0x531   : > { %1999 = vmatprep.subr.mxu1 %v1897_v48  ;;  %1929 = vmatpush1.msra.mxu0 %v1894_v49  ;;  %v2083_v48 = vld [vmem:[#allocation7 + $0x48] sm:$0xff]  ;;  %v2098_v49 = vld [vmem:[#allocation7 + $0xc0] sm:$0xff] }
 0x532   : > { %2000 = vmatpush1.msra.mxu1 %v1896_v50  ;;  %1930 = vmatprep.subr.mxu0 %v1891_v52  ;;  %v2082_v50 = vld [vmem:[#allocation7 + $0x40] sm:$0xff]  ;;  %v2097_v52 = vld [vmem:[#allocation7 + $0xb8] sm:$0xff] }
 0x533   : > { %2001 = vmatprep.subr.mxu1 %v1893_v53  ;;  %1931 = vmatpush1.msra.mxu0 %v1890_v54  ;;  %v2081_v53 = vld [vmem:[#allocation7 + $0x38] sm:$0xff]  ;;  %v2096_v54 = vld [vmem:[#allocation7 + $0xb0] sm:$0xff] }
 0x534   : > { %2002 = vmatpush1.msra.mxu1 %v1892_v55  ;;  %v2080_v55 = vld [vmem:[#allocation7 + $0x30] sm:$0xff] }
 0x535   : > { %2003 = vmatprep.subr.mxu1 %v1889_v56  ;;  %v2079_v56 = vld [vmem:[#allocation7 + $0x28] sm:$0xff] }
 0x536   : > { %2004 = vmatpush1.msra.mxu1 %v1888_v58  ;;  %v2078_v58 = vld [vmem:[#allocation7 + $0x20] sm:$0xff] }
 0x537   : > { %2005 = vmatprep.subr.mxu1 %v1885_v60  ;;  %v2077_v60 = vld [vmem:[#allocation7 + $0x18] sm:$0xff] }
 0x538   : > { %2006 = vmatpush1.msra.mxu1 %v1884_v62  ;;  %v2076_v62 = vld [vmem:[#allocation7 + $0x10] sm:$0xff] }
 0x539   : > { %2007 = vmatprep.subr.mxu1 %v1881_v2  ;;  %v2075_v2 = vld [vmem:[#allocation7 + $0x8] sm:$0xff] }
 0x53a   : > { %2008 = vmatpush1.msra.mxu1 %v1880_v5  ;;  %v2074_v5 = vld [vmem:[#allocation7] sm:$0xff] }
 0x53b   : > { %2009 = vmatprep.subr.mxu1 %v1877_v7 }
 0x53c   : > { %2010 = vmatpush1.msra.mxu1 %v1876_v9 }
 0x53d   : > { %2011 = vmatprep.subr.mxu1 %v1873_v11 }
 0x53e   : > { %2012 = vmatpush1.msra.mxu1 %v1872_v13 }
 0x53f   : > { %2013 = vmatprep.subr.mxu1 %v1869_v0 }
 0x540   : > { %2014 = vmatpush1.msra.mxu1 %v1868_v16 }
 0x541   : > { %2015 = vmatprep.subr.mxu1 %v1865_v18 }
 0x542   : > { %2016 = vmatpush1.msra.mxu1 %v1864_v20 }
 0x543   : > { %2017 = vmatprep.subr.mxu1 %v1861_v23 }
 0x544   : > { %2018 = vmatpush1.msra.mxu1 %v1860_v25 }
 0x545   : > { %2019 = vmatprep.subr.mxu1 %v1857_v27 }
 0x546   : > { %2020 = vmatpush1.msra.mxu1 %v1856_v51 }
 0x5db   : > { %v1612_v36 = vpop.f32.mrf.mxu0  ;;  %v1685_v37 = vpop.f32.mrf.mxu1 }
 0x5dc   : > { %v1835_v41 = vadd.f32 %v1685_v37, %v1612_v36  ;;  %v2105_v36 = vld [vmem:[#allocation7 + $0xf8] sm:$0xff] }
 0x5dd   : > { %v2600_v38 = vpop.f32.mrf.mxu0  ;;  %v2611_v39 = vpop.f32.mrf.mxu1  ;;  %v2089_v37 = vld [vmem:[#allocation7 + $0x78] sm:$0xff] }
 0x5de   : > { %v2104_v38 = vld [vmem:[#allocation7 + $0xf0] sm:$0xff] }
 0x5df   : > { %v2088_v39 = vld [vmem:[#allocation7 + $0x70] sm:$0xff] }
 0x5e3   : > { %v1758_v40 = vpop.f32.mrf.mxu0 }
 0x5e4   : > { %v1836_v1 = vadd.f32 %v1835_v41, %v1758_v40  ;;  %v2103_v40 = vld [vmem:[#allocation7 + $0xe8] sm:$0xff] }
 0x5e5   : > { %v2622_v42 = vpop.f32.mrf.mxu0  ;;  %v2087_v41 = vld [vmem:[#allocation7 + $0x68] sm:$0xff] }
 0x5e6   : > { %v2102_v42 = vld [vmem:[#allocation7 + $0xe0] sm:$0xff] }
 0x5e7   : > { %v1831_v43 = vpop.f32.mrf.mxu1 }
 0x5e8   : > { %v1837_v22 = vadd.f32 %v1836_v1, %v1831_v43  ;;  %v2086_v1 = vld [vmem:[#allocation7 + $0x60] sm:$0xff]  ;;  %v2101_v43 = vld [vmem:[#allocation7 + $0xd8] sm:$0xff] }
 0x5e9   : > { %v2633_v44 = vpop.f32.mrf.mxu1 }
 0x5ea   : > { %v3469_v45 = vadd.f32 %v1837_v22, %v3242_v4  ;;  %v1887_v4 = vld [vmem:[#allocation5 + $0x108] sm:$0xff]  ;;  %v2085_v22 = vld [vmem:[#allocation7 + $0x58] sm:$0xff]  ;;  %v2100_v44 = vld [vmem:[#allocation7 + $0xd0] sm:$0xff] }
 0x5eb   : > { %1932 = vmatprep.subr.mxu0 %v1887_v4  ;;  %v2095_v4 = vld [vmem:[#allocation7 + $0xa8] sm:$0xff] }
 0x5ec   : > { %v1839_v46 = vmul.f32 %v3469_v45, %v3469_v45  ;;  %1933 = vmatpush1.msra.mxu0 %v1886_v57  ;;  %v2094_v57 = vld [vmem:[#allocation7 + $0xa0] sm:$0xff] }
 0x5ed   : > { %1934 = vmatprep.subr.mxu0 %v1883_v59  ;;  %v2093_v59 = vld [vmem:[#allocation7 + $0x98] sm:$0xff] }
 0x5ee   : > { %1840 = vadd.xlane.f32.xlu1 %v1839_v46  ;;  %1935 = vmatpush1.msra.mxu0 %v1882_v61  ;;  %v2084_v46 = vld [vmem:[#allocation7 + $0x50] sm:$0xff] }
 0x5ef   : > { %1936 = vmatprep.subr.mxu0 %v1879_v63  ;;  %v2092_v61 = vld [vmem:[#allocation7 + $0x90] sm:$0xff]  ;;  %v2091_v63 = vld [vmem:[#allocation7 + $0x88] sm:$0xff] }
 0x5f0   : > { %1937 = vmatpush1.msra.mxu0 %v1878_v3  ;;  %v2090_v3 = vld [vmem:[#allocation7 + $0x80] sm:$0xff] }
 0x5f1   : > { %1938 = vmatprep.subr.mxu0 %v1875_v6 }
 0x5f2   : > { %1939 = vmatpush1.msra.mxu0 %v1874_v8 }
 0x5f3   : > { %1940 = vmatprep.subr.mxu0 %v1871_v10 }
 0x5f4   : > { %1941 = vmatpush1.msra.mxu0 %v1870_v12 }
 0x5f5   : > { %1942 = vmatprep.subr.mxu0 %v1867_v14 }
 0x5f6   : > { %1943 = vmatpush1.msra.mxu0 %v1866_v15 }
 0x5f7   : > { %1944 = vmatprep.subr.mxu0 %v1863_v17 }
 0x5f8   : > { %1945 = vmatpush1.msra.mxu0 %v1862_v19 }
 0x5f9   : > { %1946 = vmatprep.subr.mxu0 %v1859_v21 }
 0x5fa   : > { %1947 = vmatpush1.msra.mxu0 %v1858_v24 }
 0x5fb   : > { %1948 = vmatprep.subr.mxu0 %v1855_v26 }
 0x5fc   : > { %1949 = vmatpush1.msra.mxu0 %v1854_v28 }
 0x5fd   : > { %2464 = vmatprep.subr.mxu0 %v2105_v36 }
 0x677   : > { %v1841_v29 = vpop.xlane.xlu1 %1840 }
 0x678   : > { %v1842_v30 = vmul.f32 0.0078125, %v1841_v29 }
 0x67a   : > { %v1843_v31 = vadd.f32 1e-05, %v1842_v30 }
 0x67c   : > { %2779 = vrsqrt.f32 %v1843_v31 }
 0x689   : > { %v2780_v32 = vpop.eup %2779 }
 0x68a   : > { %v1845_v34 = vmul.f32 %v2780_v32, %v3469_v45 }
 0x68c   : > { %v1853_v35 = vmul.f32 %v2395_v33, %v1845_v34 }
 0x68e   : > { %1983 = vmatmul.mubr.f32.vlgmr.msra.gmra.mxu0 %v1853_v35  ;;  %2054 = vmatmul.mubr.f32.vlgmr.msra.gmra.mxu1 %v1853_v35 }
 0x68f   : > { %2465 = vmatpush3.msra.mxu0 %v2089_v37 }
 0x690   : > { %2466 = vmatprep.subr.mxu0 %v2104_v38 }
 0x691   : > { %2467 = vmatpush3.msra.mxu0 %v2088_v39 }
 0x692   : > { %2468 = vmatprep.subr.mxu0 %v2103_v40 }
 0x693   : > { %2469 = vmatpush3.msra.mxu0 %v2087_v41 }
 0x694   : > { %2470 = vmatprep.subr.mxu0 %v2102_v42 }
 0x695   : > { %2471 = vmatpush3.msra.mxu0 %v2086_v1 }
 0x696   : > { %2472 = vmatprep.subr.mxu0 %v2101_v43 }
 0x697   : > { %2473 = vmatpush3.msra.mxu0 %v2085_v22 }
 0x698   : > { %2474 = vmatprep.subr.mxu0 %v2100_v44 }
 0x699   : > { %2475 = vmatpush3.msra.mxu0 %v2084_v46 }
 0x69a   : > { %2476 = vmatprep.subr.mxu0 %v2099_v47 }
 0x69b   : > { %2477 = vmatpush3.msra.mxu0 %v2083_v48 }
 0x69c   : > { %2478 = vmatprep.subr.mxu0 %v2098_v49 }
 0x69d   : > { %2479 = vmatpush3.msra.mxu0 %v2082_v50 }
 0x69e   : > { %2480 = vmatprep.subr.mxu0 %v2097_v52 }
 0x69f   : > { %2481 = vmatpush3.msra.mxu0 %v2081_v53 }
 0x6a0   : > { %2482 = vmatprep.subr.mxu0 %v2096_v54 }
 0x6a1   : > { %2483 = vmatpush3.msra.mxu0 %v2080_v55 }
 0x6a2   : > { %2484 = vmatprep.subr.mxu0 %v2095_v4 }
 0x6a3   : > { %2485 = vmatpush3.msra.mxu0 %v2079_v56 }
 0x6a4   : > { %2486 = vmatprep.subr.mxu0 %v2094_v57 }
 0x6a5   : > { %2487 = vmatpush3.msra.mxu0 %v2078_v58 }
 0x6a6   : > { %2488 = vmatprep.subr.mxu0 %v2093_v59 }
 0x6a7   : > { %2489 = vmatpush3.msra.mxu0 %v2077_v60 }
 0x6a8   : > { %2490 = vmatprep.subr.mxu0 %v2092_v61 }
 0x6a9   : > { %2491 = vmatpush3.msra.mxu0 %v2076_v62 }
 0x6aa   : > { %2492 = vmatprep.subr.mxu0 %v2091_v63 }
 0x6ab   : > { %2493 = vmatpush3.msra.mxu0 %v2075_v2 }
 0x6ac   : > { %2494 = vmatprep.subr.mxu0 %v2090_v3 }
 0x6ad   : > { %2495 = vmatpush3.msra.mxu0 %v2074_v5 }
 0x74e   : > { %v1984_v6 = vpop.f32.mrf.mxu0  ;;  %v2055_v16 = vpop.f32.mrf.mxu1 }
 0x74f   : > { %v2060_v7 = vsub.f32 0.0, %v1984_v6 }
 0x750   : > { %v1986_v8 = vpop.f32.mrf.mxu0  ;;  %v2057_v20 = vpop.f32.mrf.mxu1 }
 0x751   : > { %v2062_v9 = vmul.f32 1.442695, %v2060_v7  ;;  %v2061_v10 = vsub.f32 0.0, %v1986_v8 }
 0x753   : > { %2781 = vpow2.f32 %v2062_v9  ;;  %v2064_v11 = vmul.f32 1.442695, %v2061_v10 }
 0x755   : > { %2783 = vpow2.f32 %v2064_v11 }
 0x760   : > { %v2782_v12 = vpop.eup %2781 }
 0x761   : > { %v2066_v13 = vadd.f32 1.0, %v2782_v12 }
 0x762   : > { %v2784_v14 = vpop.eup %2783 }
 0x763   : > { %2785 = vrcp.f32 %v2066_v13  ;;  %v2067_v0 = vadd.f32 1.0, %v2784_v14 }
 0x765   : > { %2787 = vrcp.f32 %v2067_v0 }
 0x770   : > { %v2786_v15 = vpop.eup %2785 }
 0x771   : > { %v2070_v18 = vmul.f32 %v2786_v15, %v1984_v6 }
 0x772   : > { %v2788_v17 = vpop.eup %2787 }
 0x773   : > { %v2071_v19 = vmul.f32 %v2788_v17, %v1986_v8  ;;  %v2072_v23 = vmul.f32 %v2070_v18, %v2055_v16 }
 0x775   : > { %v2073_v21 = vmul.f32 %v2071_v19, %v2057_v20 }
 0x777   : > { %2170 = vmatprep.mubr.f32.mxu0 %v2073_v21 }
 0x778   : > { %2171 = vmatmul.mubr.f32.vlgmr.msra.gmra.mxu0 %v2072_v23 }
 0x838   : > { %v2496_v24 = vpop.f32.mrf.mxu0 }
 0x83a   : > { %v2497_v25 = vpop.f32.mrf.mxu0 }
 0x83b   : > { %v2498_v26 = vadd.f32 %v2497_v25, %v2496_v24 }
 0x83d   : > { %v2176_v27 = vadd.f32 %v2498_v26, %v3469_v45 }
 0x83f   : > { %2177 = vst [vmem:[%s555_s25] sm:$0xff] %v2176_v27 }
 0x840   : > { %2906 = shalt.err (!%p2903_p2)
}
 0x841   : > { %s2907_s23 = scalar_lea.hbm %s2192_s30, 128  ;;  %s2911_s27 = scalar_lea.hbm %s3562_s19, 512 }
 0x842   : > { %p2908_p4 = scmp.ne.s32.totalorder %s2192_s30, %s2907_s23  ;;  %p2912_p10 = scmp.lt.s32.totalorder %s2192_s30, %s3562_s19 }
 0x843   : > { %p2913_p0 = scmp.lt.s32.totalorder %s2911_s27, %s2907_s23 }
 0x844   : > { %p2909_p5 = pnand %p2908_p4, %p3137_p3 }
 0x845   : > { %p2914_p12 = por %p2913_p0, %p2912_p10 }
 0x846   : > { %p2910_p6 = pneg %p2909_p5 }
 0x848   : > { %p2915_p1 = pnand %p2914_p12, %p2910_p6 }
 0x84a   : > { %2918 = shalt.err (!%p2915_p1)
}
 0x84b   : > { %2650 = dma.vmem_to_hbm [thread:$0]  (%p3137_p3), %s2195_s17, 128, %s2192_s30, %s2179_s24  }
 0x84c PF: > { %s3563_s3 = sld [smem:[#allocation15_spill]]  ;;  %p2677_p7 = scmp.ge.s32.totalorder %s2997_s15, 2 }
 0x84e   : > { %p2666_p9 = pnand %p2677_p7, %p3146_p8 }
 0x850   : > { %p2667_p11 = pneg %p2666_p9 }
 0x852   : > { %s2206_s14 = sand.u32 1, %s3563_s3  }
 0x853   : > { %s2207_s28 = scalar_lea.sflag [#allocation4], %s2206_s14 }
 0x854   : > { %2964 = dma.done.wait (%p2667_p11), %s2207_s28, 128  }
 0x855   : > { %2966 = vsyncadd (%p2667_p11), %s2207_s28, 4294967168  ;;  %s29_s15 = sadd.s32 1, %s2997_s15   ;;  %s3565_s29 = sld [smem:[#allocation16_spill]] }
 0x856   : > { %p26_p13 = scmp.ge.s32.totalorder %s29_s15, 6   ;;  %s3566_s27 = sld [smem:[#allocation22_spill]] }
 0x857   : > { %s3567_s28 = sld [smem:[#allocation17_spill]]  ;;  %s3571_s25 = smov %s2973_s26 }
 0x858   : > { %s3568_s22 = sld [smem:[#allocation18_spill]] }
 0x859   : > { %s3569_s30 = sld [smem:[#allocation19_spill]] }
 0x85a   : > { %s3570_s14 = sld [smem:[#allocation20_spill]]  ;;  %28 = sbr.rel (!%p26_p13) target bundleno = 11 (0xb), region = 133 }
 0x85b   : > { %s3572_s26 = smov %s3565_s29 }
 0x85e   : > { %s3573_s29 = smov %s3568_s22 }
 0x85f   :  { %2212 = vsyncpa [#allocation3], 1 }
 0x860   :  { %2214 = vsyncpa [#allocation3 + $0x1], 1 }
 0x861   :  { %2215 = vsyncpa [#allocation6], 1 }
 0x862   :  { %2216 = vsyncpa [#allocation9], 1 }
 0x863   :  { %2217 = vsyncpa [#allocation4], 1 }
 0x864   :  { %2219 = vsyncpa [#allocation4 + $0x1], 1 }

</bundles_post_ra>
